<compile_context>
chip_gen: v7x
topology: tpu7x:2x2x1
jax: 0.10.0
libtpu: 0.0.40
codegen_flags: <defaults>
</compile_context>

<pallas_src>
import jax
import jax.numpy as jnp
from jax import lax
from jax.experimental import pallas as pl
from jax.experimental.pallas import tpu as pltpu

CIN = 5            # stacked input channels: [e1, rel, time1, time2, his]
KSIZE = 3          # Conv1d kernel size
EPS = 1e-5         # BatchNorm eps (PyTorch default)
SCORE_ENTITY_TILE = 1024   # entity tile for the score matmul (multiple of 128)


def _round_up(x, m):
    return (x + m - 1) // m * m


# ---------------------------------------------------------------------------
# Kernel B: fused  fc1 -> stack -> bn0 -> conv1d(+flatten) -> bn1 -> relu
#                  -> fc -> bn2 -> relu
# All intermediates are (B, n*D) with the channel index folded onto the lane
# axis (column c*D + d), which matches torch's .view(B, -1) flatten exactly.
# ---------------------------------------------------------------------------
def _fused_kernel(e1_ref, rel_ref, t1_ref, t2_ref, his_ref,
                  w_fc1_ref, b_fc1_ref,
                  p0_ref, p0t_ref, g0_ref, b0_ref,
                  band_ref, bconv_ref,
                  p1_ref, p1t_ref, g1_ref, b1_ref,
                  w_fc_ref, b_fc_ref, g2_ref, b2_ref,
                  out_ref):
    B, D = e1_ref.shape

    # fc1 projection of the semantic history embedding: (B, S) @ (S, D) + b
    his = jnp.dot(his_ref[...], w_fc1_ref[...],
                  preferred_element_type=jnp.float32) + b_fc1_ref[...]

    # stacked_inputs (conceptually (B, 5, D), NCW) flattened channel-major
    # along lanes: column i*D + d  (lane-dense: 5*D wide).
    x5 = jnp.concatenate(
        [e1_ref[...], rel_ref[...], t1_ref[...], t2_ref[...], his], axis=1)

    def batch_norm(x, pool_ref, poolt_ref, gamma_ref, beta_ref):
        # Training-mode BatchNorm1d with per-channel batch statistics; channels
        # are D-wide column blocks.  Stats for ALL channels are computed with
        # one sublane reduction + one tiny pooling matmul per moment (batched,
        # no serialized per-channel XLU reductions).
        n = x.shape[0] * D                     # elements per channel = B * D
        colsum = jnp.sum(x, axis=0, keepdims=True)
        colsq = jnp.sum(x * x, axis=0, keepdims=True)
        mean = jnp.dot(colsum, pool_ref[...],
                       preferred_element_type=jnp.float32) / n
        ex2 = jnp.dot(colsq, pool_ref[...],
                      preferred_element_type=jnp.float32) / n
        var = jnp.maximum(ex2 - mean * mean, 0.0)     # biased variance
        inv = lax.rsqrt(var + EPS)
        mean_e = jnp.dot(mean, poolt_ref[...], preferred_element_type=jnp.float32)
        inv_e = jnp.dot(inv, poolt_ref[...], preferred_element_type=jnp.float32)
        return (x - mean_e) * inv_e * gamma_ref[...] + beta_ref[...]

    # bn0 over the 5 input channels (batched)
    xn = batch_norm(x5, p0_ref, p0t_ref, g0_ref, b0_ref)
    # TODO(synk): inp_drop / feature_map_drop / hidden_drop are identity (rate 0).

    # Conv1d(5, C, 3, padding=1) + torch .view(B, -1) flatten as ONE MXU matmul:
    # band_ref is the host-side banded weight (5*D, C*D) whose band structure
    # encodes both the +/-1 taps and the zero padding at the sequence ends, so
    # the output lands directly in the (B, C*D) channel-major layout.
    pre = jnp.dot(xn, band_ref[...],
                  preferred_element_type=jnp.float32) + bconv_ref[...]

    # bn1 over the C conv channels (batched) + relu
    h1 = jnp.maximum(batch_norm(pre, p1_ref, p1t_ref, g1_ref, b1_ref), 0.0)

    # fc: (B, C*D) @ (C*D, D) + bias
    h = jnp.dot(h1, w_fc_ref[...],
                preferred_element_type=jnp.float32) + b_fc_ref[...]

    # bn2 (only applied when batch_size > 1 in the PyTorch module), then relu
    if B > 1:
        m2 = jnp.mean(h, axis=0, keepdims=True)
        v2 = jnp.maximum(jnp.mean(h * h, axis=0, keepdims=True) - m2 * m2, 0.0)
        h = (h - m2) * lax.rsqrt(v2 + EPS) * g2_ref[...] + b2_ref[...]
    out_ref[...] = jnp.maximum(h, 0.0)


def fused_conv_path(kp, e1, rel, t1, t2, his):
    # TODO(synk): for production-scale batches, grid over B (mark it "parallel"
    # for v7x's 2 TensorCores) with a two-pass stats/apply split so the
    # footprint stays inside v7x's 64 MiB VMEM; at these sizes one block fits.
    B, D = e1.shape
    vmem = pl.BlockSpec(memory_space=pltpu.MemorySpace.VMEM)
    args = (e1, rel, t1, t2, his,
            kp["w_fc1"], kp["b_fc1"],
            kp["p0"], kp["p0t"], kp["g0_e"], kp["b0_e"],
            kp["conv_band"], kp["b_conv_e"],
            kp["p1"], kp["p1t"], kp["g1_e"], kp["b1_e"],
            kp["w_fc_t"], kp["b_fc"], kp["g2"], kp["b2"])
    return pl.pallas_call(
        _fused_kernel,
        out_shape=jax.ShapeDtypeStruct((B, D), jnp.float32),
        in_specs=[vmem] * len(args),
        out_specs=vmem,
        compiler_params=pltpu.CompilerParams(vmem_limit_bytes=64 * 1024 * 1024),
    )(*args)


# ---------------------------------------------------------------------------
# Kernel C: score matmul  x (B, D) @ tanh(embedding)^T, tiled over entities.
# tanh is fused into the kernel (EUP slot is free relative to the HBM read),
# so the raw embedding table is streamed exactly once.
# ---------------------------------------------------------------------------
def _score_kernel(x_ref, emb_ref, o_ref):
    t = jnp.tanh(emb_ref[...])
    o_ref[...] = lax.dot_general(
        x_ref[...], t,
        dimension_numbers=(((1,), (1,)), ((), ())),
        preferred_element_type=jnp.float32)


def _score_mask_kernel(x_ref, emb_ref, p_ref, o_ref):
    t = jnp.tanh(emb_ref[...])
    s = lax.dot_general(
        x_ref[...], t,
        dimension_numbers=(((1,), (1,)), ((), ())),
        preferred_element_type=jnp.float32)
    o_ref[...] = s * p_ref[...]


def score_matmul(x, embedding, partial_embeding=None,
                 entity_tile=SCORE_ENTITY_TILE):
    # NOTE: if the entity table is kept persistently in bf16, stream it as bf16
    # here (halves HBM traffic); a per-call f32->bf16 cast would ADD traffic,
    # so the table is streamed in its stored dtype (f32) instead.
    B, D = x.shape
    E = embedding.shape[0]
    te = min(entity_tile, _round_up(E, 128))
    e_pad = _round_up(E, te)
    if e_pad != E:
        # zero-pad the tail tile: tanh(0) = 0 -> padded scores are 0 and are
        # sliced off below, so results are exact.
        embedding = jnp.pad(embedding, ((0, e_pad - E), (0, 0)))
        if partial_embeding is not None:
            partial_embeding = jnp.pad(partial_embeding,
                                       ((0, 0), (0, e_pad - E)))

    grid = (e_pad // te,)
    x_spec = pl.BlockSpec((B, D), lambda j: (0, 0))
    emb_spec = pl.BlockSpec((te, D), lambda j: (j, 0))
    out_spec = pl.BlockSpec((B, te), lambda j: (0, j))
    cp = pltpu.CompilerParams(dimension_semantics=("parallel",),
                              vmem_limit_bytes=64 * 1024 * 1024)
    cost = pl.CostEstimate(flops=2 * B * D * e_pad,
                           transcendentals=e_pad * D,
                           bytes_accessed=(e_pad * D + B * D + B * e_pad) * 4)

    if partial_embeding is None:
        out = pl.pallas_call(
            _score_kernel,
            out_shape=jax.ShapeDtypeStruct((B, e_pad), jnp.float32),
            grid=grid,
            in_specs=[x_spec, emb_spec],
            out_specs=out_spec,
            compiler_params=cp,
            cost_estimate=cost,
        )(x, embedding)
    else:
        p_spec = pl.BlockSpec((B, te), lambda j: (0, j))
        out = pl.pallas_call(
            _score_mask_kernel,
            out_shape=jax.ShapeDtypeStruct((B, e_pad), jnp.float32),
            grid=grid,
            in_specs=[x_spec, emb_spec, p_spec],
            out_specs=out_spec,
            compiler_params=cp,
            cost_estimate=cost,
        )(x, embedding, partial_embeding)
    return out[:, :E] if e_pad != E else out


# ---------------------------------------------------------------------------
# Parameters (deterministic, mirrors module __init__ shapes) + preprocessing
# ---------------------------------------------------------------------------
def init_params(key, num_entities, embedding_dim, semantic_dim, channels,
                kernel_size=KSIZE):
    D, S, C = embedding_dim, semantic_dim, channels
    ks = jax.random.split(key, 6)
    p = {}
    # fc1 = Linear(S, D); stored pre-transposed as (S, D) so kernels do x @ W
    p["w_fc1"] = 0.1 * jax.random.normal(ks[0], (S, D), jnp.float32)
    p["b_fc1"] = 0.1 * jax.random.normal(ks[1], (1, D), jnp.float32)
    # conv1 = Conv1d(5, C, kernel_size); weight (C, 5, K)
    p["w_conv"] = 0.1 * jax.random.normal(ks[2], (C, CIN, kernel_size), jnp.float32)
    p["b_conv"] = 0.1 * jax.random.normal(ks[3], (C,), jnp.float32)
    # fc = Linear(C*D, D); stored pre-transposed as (C*D, D)
    p["w_fc_t"] = 0.05 * jax.random.normal(ks[4], (C * D, D), jnp.float32)
    p["b_fc"] = 0.1 * jax.random.normal(ks[5], (1, D), jnp.float32)
    # BatchNorm affine params: PyTorch defaults (weight=1, bias=0)
    p["g0"] = jnp.ones((CIN,), jnp.float32)
    p["b0"] = jnp.zeros((CIN,), jnp.float32)
    p["g1"] = jnp.ones((C,), jnp.float32)
    p["b1"] = jnp.zeros((C,), jnp.float32)
    p["g2"] = jnp.ones((1, D), jnp.float32)
    p["b2"] = jnp.zeros((1, D), jnp.float32)
    # self.b (num_entities,) exists in the module but is never used in forward()
    p["b_ent"] = jnp.zeros((num_entities,), jnp.float32)
    return p


def prepare_kernel_params(p, embedding_dim):
    """One-time host-side preprocessing of the raw parameters for the kernels."""
    D = embedding_dim
    C = p["w_conv"].shape[0]

    # Banded conv weight (5*D, C*D): band[i*D + d', c*D + d] = w[c, i, k] iff
    # d' = d + k - 1 (in range), else 0 -> encodes shift taps + zero padding.
    r = jnp.arange(D)
    bands = jnp.stack(
        [(r[:, None] == r[None, :] + (k - 1)).astype(jnp.float32)
         for k in range(KSIZE)])                              # (K, D, D)
    conv_band = jnp.einsum("cik,kxy->ixcy", p["w_conv"], bands).reshape(
        CIN * D, C * D)
    # NOTE: the dense band trades ~D/3 extra MXU flops for a fully
    # relayout-free, scalar-load-free conv; fine at these sizes (MXU is idle).
    # TODO(synk): for very large D*C, tile this or use the 15-wide contraction.

    def pool(n_ch):
        rows = jnp.arange(n_ch * D) // D
        cols = jnp.arange(n_ch)
        return (rows[:, None] == cols[None, :]).astype(jnp.float32)  # (n_ch*D, n_ch)

    p0 = pool(CIN)
    p1 = pool(C)
    return dict(
        w_fc1=p["w_fc1"], b_fc1=p["b_fc1"],
        conv_band=conv_band,
        b_conv_e=jnp.repeat(p["b_conv"], D)[None, :],          # (1, C*D)
        p0=p0, p0t=p0.T, p1=p1, p1t=p1.T,
        g0_e=jnp.repeat(p["g0"], D)[None, :],                  # (1, 5*D)
        b0_e=jnp.repeat(p["b0"], D)[None, :],
        g1_e=jnp.repeat(p["g1"], D)[None, :],                  # (1, C*D)
        b1_e=jnp.repeat(p["b1"], D)[None, :],
        w_fc_t=p["w_fc_t"], b_fc=p["b_fc"], g2=p["g2"], b2=p["b2"],
    )


# ---------------------------------------------------------------------------
# Forward (mirrors SeConvTransE.forward)
# ---------------------------------------------------------------------------
def se_conv_trans_e_forward(kparams, embedding, emb_rel, emb_time, triplets,
                            e_r_his_emb, partial_embeding=None):
    # e1_embedded_all = tanh(embedding): the full-table tanh is fused into the
    # score kernel; only the B gathered rows need a tanh here (plain JAX glue).
    e1 = jnp.tanh(embedding[triplets[:, 0]])
    rel = emb_rel[triplets[:, 1]]
    t1, t2 = emb_time
    # fused conv path (Pallas kernel B) -> (B, D) hidden
    x = fused_conv_path(kparams, e1, rel, t1, t2, e_r_his_emb)
    # scores = x @ tanh(embedding).T [* partial]   (Pallas kernel C, tiled)
    return score_matmul(x, embedding, partial_embeding)


# ---------------------------------------------------------------------------
# Pure-JAX reference (written straight from the PyTorch spec) for validation
# ---------------------------------------------------------------------------
def reference_forward(raw, embedding, emb_rel, emb_time, triplets, e_r_his_emb,
                      partial_embeding=None):
    tanh_emb = jnp.tanh(embedding)
    e1 = tanh_emb[triplets[:, 0]]
    rel = emb_rel[triplets[:, 1]]
    t1, t2 = emb_time
    his = e_r_his_emb @ raw["w_fc1"] + raw["b_fc1"]
    x = jnp.stack([e1, rel, t1, t2, his], axis=1)              # (B, 5, D)
    B, _, D = x.shape
    m0 = jnp.mean(x, axis=(0, 2), keepdims=True)
    v0 = jnp.var(x, axis=(0, 2), keepdims=True)
    x = (x - m0) / jnp.sqrt(v0 + EPS) * raw["g0"][None, :, None] + raw["b0"][None, :, None]
    xp = jnp.pad(x, ((0, 0), (0, 0), (1, 1)))
    taps = jnp.stack([xp[:, :, k:k + D] for k in range(KSIZE)], axis=-1)
    conv = jnp.einsum("bidk,cik->bcd", taps, raw["w_conv"]) + raw["b_conv"][None, :, None]
    m1 = jnp.mean(conv, axis=(0, 2), keepdims=True)
    v1 = jnp.var(conv, axis=(0, 2), keepdims=True)
    conv = (conv - m1) / jnp.sqrt(v1 + EPS) * raw["g1"][None, :, None] + raw["b1"][None, :, None]
    conv = jnp.maximum(conv, 0.0)
    flat = conv.reshape(B, -1)
    h = flat @ raw["w_fc_t"] + raw["b_fc"]
    if B > 1:
        m2 = jnp.mean(h, axis=0, keepdims=True)
        v2 = jnp.var(h, axis=0, keepdims=True)
        h = (h - m2) / jnp.sqrt(v2 + EPS) * raw["g2"] + raw["b2"]
    h = jnp.maximum(h, 0.0)
    scores = h @ tanh_emb.T
    if partial_embeding is not None:
        scores = scores * partial_embeding
    return scores


if __name__ == "__main__":
    num_entities, embedding_dim, semantic_dim = 256, 32, 16
    channels, num_relations, batch = 8, 10, 8

    key = jax.random.PRNGKey(0)
    keys = jax.random.split(key, 10)
    embedding = jax.random.normal(keys[0], (num_entities, embedding_dim), jnp.float32)
    emb_rel = jax.random.normal(keys[1], (num_relations, embedding_dim), jnp.float32)
    emb_time = (jax.random.normal(keys[2], (batch, embedding_dim), jnp.float32),
                jax.random.normal(keys[3], (batch, embedding_dim), jnp.float32))
    e_r_his_emb = jax.random.normal(keys[4], (batch, semantic_dim), jnp.float32)
    triplets = jnp.concatenate([
        jax.random.randint(keys[5], (batch, 1), 0, num_entities),
        jax.random.randint(keys[6], (batch, 1), 0, num_relations),
        jax.random.randint(keys[7], (batch, 1), 0, num_entities),
    ], axis=1).astype(jnp.int32)

    raw = init_params(keys[8], num_entities, embedding_dim, semantic_dim, channels)
    kparams = prepare_kernel_params(raw, embedding_dim)

    fwd = jax.jit(se_conv_trans_e_forward)
    out = fwd(kparams, embedding, emb_rel, emb_time, triplets, e_r_his_emb)
    jax.block_until_ready(out)
    assert out.shape == (batch, num_entities) and out.dtype == jnp.float32
    assert bool(jnp.all(jnp.isfinite(out)))

    # correctness vs. a pure-JAX reference of the PyTorch forward
    ref = reference_forward(raw, embedding, emb_rel, emb_time, triplets, e_r_his_emb)
    err = float(jnp.max(jnp.abs(out - ref)))
    scale = float(jnp.max(jnp.abs(ref))) + 1.0
    assert err <= 5e-2 * scale, f"mismatch vs reference: {err} (scale {scale})"

    # partial_embeding path (entity mask)
    partial = (jax.random.uniform(keys[9], (batch, num_entities)) > 0.5).astype(jnp.float32)
    out_p = fwd(kparams, embedding, emb_rel, emb_time, triplets, e_r_his_emb, partial)
    jax.block_until_ready(out_p)
    assert out_p.shape == (batch, num_entities)
    assert bool(jnp.all(jnp.isfinite(out_p)))

    print("KERNEL_OK")
</pallas_src>

<mosaic_0001>
module attributes {stable_mosaic.version = 11 : i64} {
  func.func @_score_kernel(%arg0: i32, %arg1: memref<8x32xf32, #tpu.memory_space<vmem>>, %arg2: memref<256x32xf32, #tpu.memory_space<vmem>>, %arg3: memref<8x256xf32, #tpu.memory_space<vmem>>) attributes {dimension_semantics = [#tpu.dimension_semantics<parallel>], iteration_bounds = array<i64: 1>, scalar_prefetch = 0 : i64, scratch_operands = 0 : i64, tpu.core_type = #tpu.core_type<tc>, window_params = [{pipeline_mode = #tpu.pipeline_mode<synchronous>, transform_indices = @transform_0, window_bounds = array<i64: 8, 32>}, {transform_indices = @transform_1, window_bounds = array<i64: 256, 32>}, {transform_indices = @transform_2, window_bounds = array<i64: 8, 256>}]} {
    %c0 = arith.constant 0 : index
    %c0_0 = arith.constant 0 : index
    %0 = vector.load %arg2[%c0, %c0_0] : memref<256x32xf32, #tpu.memory_space<vmem>>, vector<256x32xf32>
    %1 = math.tanh %0 : vector<256x32xf32>
    %c0_1 = arith.constant 0 : index
    %c0_2 = arith.constant 0 : index
    %2 = vector.load %arg1[%c0_1, %c0_2] : memref<8x32xf32, #tpu.memory_space<vmem>>, vector<8x32xf32>
    %cst = arith.constant dense<0.000000e+00> : vector<8x256xf32>
    %3 = tpu.matmul %2, %1, %cst {dimension_numbers = #tpu.dot_dimension_numbers<[1], [1], [0], [0], [0, 0, 1, 0], [], []>} : vector<8x32xf32>, vector<256x32xf32>, vector<8x256xf32> -> vector<8x256xf32>
    %c0_3 = arith.constant 0 : index
    %c0_4 = arith.constant 0 : index
    %4 = vector.load %arg3[%c0_3, %c0_4] : memref<8x256xf32, #tpu.memory_space<vmem>>, vector<8x256xf32>
    tpu.vector_store %arg3[%c0_3, %c0_4], %3 {strides = array<i32>} : memref<8x256xf32, #tpu.memory_space<vmem>>, vector<8x256xf32>,
    return
  }
  func.func @transform_0(%arg0: i32) -> (i32, i32) {
    %c0_i32 = arith.constant 0 : i32
    %c0_i32_0 = arith.constant 0 : i32
    %c0_i32_1 = arith.constant 0 : i32
    return %c0_i32, %c0_i32_0 : i32, i32
  }
  func.func @transform_1(%arg0: i32) -> (i32, i32) {
    %c0_i32 = arith.constant 0 : i32
    %c0_i32_0 = arith.constant 0 : i32
    return %arg0, %c0_i32 : i32, i32
  }
  func.func @transform_2(%arg0: i32) -> (i32, i32) {
    %c0_i32 = arith.constant 0 : i32
    %c0_i32_0 = arith.constant 0 : i32
    return %c0_i32, %arg0 : i32, i32
  }
}

module attributes {stable_mosaic.version = 11 : i64} {
  func.func @_fused_kernel(%arg0: memref<8x32xf32, #tpu.memory_space<vmem>>, %arg1: memref<8x32xf32, #tpu.memory_space<vmem>>, %arg2: memref<8x32xf32, #tpu.memory_space<vmem>>, %arg3: memref<8x32xf32, #tpu.memory_space<vmem>>, %arg4: memref<8x16xf32, #tpu.memory_space<vmem>>, %arg5: memref<16x32xf32, #tpu.memory_space<vmem>>, %arg6: memref<1x32xf32, #tpu.memory_space<vmem>>, %arg7: memref<160x5xf32, #tpu.memory_space<vmem>>, %arg8: memref<5x160xf32, #tpu.memory_space<vmem>>, %arg9: memref<1x160xf32, #tpu.memory_space<vmem>>, %arg10: memref<1x160xf32, #tpu.memory_space<vmem>>, %arg11: memref<160x256xf32, #tpu.memory_space<vmem>>, %arg12: memref<1x256xf32, #tpu.memory_space<vmem>>, %arg13: memref<256x8xf32, #tpu.memory_space<vmem>>, %arg14: memref<8x256xf32, #tpu.memory_space<vmem>>, %arg15: memref<1x256xf32, #tpu.memory_space<vmem>>, %arg16: memref<1x256xf32, #tpu.memory_space<vmem>>, %arg17: memref<256x32xf32, #tpu.memory_space<vmem>>, %arg18: memref<1x32xf32, #tpu.memory_space<vmem>>, %arg19: memref<1x32xf32, #tpu.memory_space<vmem>>, %arg20: memref<1x32xf32, #tpu.memory_space<vmem>>, %arg21: memref<8x32xf32, #tpu.memory_space<vmem>>) attributes {dimension_semantics = [], scalar_prefetch = 0 : i64, scratch_operands = 0 : i64, tpu.core_type = #tpu.core_type<tc>} {
    %c0 = arith.constant 0 : index
    %c0_0 = arith.constant 0 : index
    %0 = vector.load %arg4[%c0, %c0_0] : memref<8x16xf32, #tpu.memory_space<vmem>>, vector<8x16xf32>
    %c0_1 = arith.constant 0 : index
    %c0_2 = arith.constant 0 : index
    %1 = vector.load %arg5[%c0_1, %c0_2] : memref<16x32xf32, #tpu.memory_space<vmem>>, vector<16x32xf32>
    %cst = arith.constant dense<0.000000e+00> : vector<8x32xf32>
    %2 = tpu.matmul %0, %1, %cst {dimension_numbers = #tpu.dot_dimension_numbers<[1], [0], [0], [1], [0, 0, 1, 1], [], []>} : vector<8x16xf32>, vector<16x32xf32>, vector<8x32xf32> -> vector<8x32xf32>
    %c0_3 = arith.constant 0 : index
    %c0_4 = arith.constant 0 : index
    %3 = vector.load %arg6[%c0_3, %c0_4] : memref<1x32xf32, #tpu.memory_space<vmem>>, vector<1x32xf32>
    %4 = vector.broadcast %3 : vector<1x32xf32> to vector<8x32xf32>
    %5 = arith.addf %2, %4 : vector<8x32xf32>
    %c0_5 = arith.constant 0 : index
    %c0_6 = arith.constant 0 : index
    %6 = vector.load %arg0[%c0_5, %c0_6] : memref<8x32xf32, #tpu.memory_space<vmem>>, vector<8x32xf32>
    %c0_7 = arith.constant 0 : index
    %c0_8 = arith.constant 0 : index
    %7 = vector.load %arg1[%c0_7, %c0_8] : memref<8x32xf32, #tpu.memory_space<vmem>>, vector<8x32xf32>
    %c0_9 = arith.constant 0 : index
    %c0_10 = arith.constant 0 : index
    %8 = vector.load %arg2[%c0_9, %c0_10] : memref<8x32xf32, #tpu.memory_space<vmem>>, vector<8x32xf32>
    %c0_11 = arith.constant 0 : index
    %c0_12 = arith.constant 0 : index
    %9 = vector.load %arg3[%c0_11, %c0_12] : memref<8x32xf32, #tpu.memory_space<vmem>>, vector<8x32xf32>
    %10 = tpu.concatenate %6, %7, %8, %9, %5 in 1 : vector<8x32xf32>, vector<8x32xf32>, vector<8x32xf32>, vector<8x32xf32>, vector<8x32xf32> -> vector<8x160xf32>
    %cst_13 = arith.constant dense<0.000000e+00> : vector<160xf32>
    %11 = vector.multi_reduction <add>, %10, %cst_13 [0] : vector<8x160xf32> to vector<160xf32>
    %12 = vector.shape_cast %11 : vector<160xf32> to vector<1x160xf32>
    %13 = arith.mulf %10, %10 : vector<8x160xf32>
    %cst_14 = arith.constant dense<0.000000e+00> : vector<160xf32>
    %14 = vector.multi_reduction <add>, %13, %cst_14 [0] : vector<8x160xf32> to vector<160xf32>
    %15 = vector.shape_cast %14 : vector<160xf32> to vector<1x160xf32>
    %c0_15 = arith.constant 0 : index
    %c0_16 = arith.constant 0 : index
    %16 = vector.load %arg7[%c0_15, %c0_16] : memref<160x5xf32, #tpu.memory_space<vmem>>, vector<160x5xf32>
    %cst_17 = arith.constant dense<0.000000e+00> : vector<1x5xf32>
    %17 = tpu.matmul %12, %16, %cst_17 {dimension_numbers = #tpu.dot_dimension_numbers<[1], [0], [0], [1], [0, 0, 1, 1], [], []>} : vector<1x160xf32>, vector<160x5xf32>, vector<1x5xf32> -> vector<1x5xf32>
    %cst_18 = arith.constant 2.560000e+02 : f32
    %18 = vector.broadcast %cst_18 : f32 to vector<1x5xf32>
    %19 = arith.divf %17, %18 : vector<1x5xf32>
    %c0_19 = arith.constant 0 : index
    %c0_20 = arith.constant 0 : index
    %20 = vector.load %arg7[%c0_19, %c0_20] : memref<160x5xf32, #tpu.memory_space<vmem>>, vector<160x5xf32>
    %cst_21 = arith.constant dense<0.000000e+00> : vector<1x5xf32>
    %21 = tpu.matmul %15, %20, %cst_21 {dimension_numbers = #tpu.dot_dimension_numbers<[1], [0], [0], [1], [0, 0, 1, 1], [], []>} : vector<1x160xf32>, vector<160x5xf32>, vector<1x5xf32> -> vector<1x5xf32>
    %cst_22 = arith.constant 2.560000e+02 : f32
    %22 = vector.broadcast %cst_22 : f32 to vector<1x5xf32>
    %23 = arith.divf %21, %22 : vector<1x5xf32>
    %24 = arith.mulf %19, %19 : vector<1x5xf32>
    %25 = arith.subf %23, %24 : vector<1x5xf32>
    %cst_23 = arith.constant 0.000000e+00 : f32
    %26 = vector.broadcast %cst_23 : f32 to vector<1x5xf32>
    %27 = arith.maximumf %25, %26 : vector<1x5xf32>
    %cst_24 = arith.constant 9.99999974E-6 : f32
    %28 = vector.broadcast %cst_24 : f32 to vector<1x5xf32>
    %29 = arith.addf %27, %28 : vector<1x5xf32>
    %30 = math.rsqrt %29 : vector<1x5xf32>
    %c0_25 = arith.constant 0 : index
    %c0_26 = arith.constant 0 : index
    %31 = vector.load %arg8[%c0_25, %c0_26] : memref<5x160xf32, #tpu.memory_space<vmem>>, vector<5x160xf32>
    %cst_27 = arith.constant dense<0.000000e+00> : vector<1x160xf32>
    %32 = tpu.matmul %19, %31, %cst_27 {dimension_numbers = #tpu.dot_dimension_numbers<[1], [0], [0], [1], [0, 0, 1, 1], [], []>} : vector<1x5xf32>, vector<5x160xf32>, vector<1x160xf32> -> vector<1x160xf32>
    %c0_28 = arith.constant 0 : index
    %c0_29 = arith.constant 0 : index
    %33 = vector.load %arg8[%c0_28, %c0_29] : memref<5x160xf32, #tpu.memory_space<vmem>>, vector<5x160xf32>
    %cst_30 = arith.constant dense<0.000000e+00> : vector<1x160xf32>
    %34 = tpu.matmul %30, %33, %cst_30 {dimension_numbers = #tpu.dot_dimension_numbers<[1], [0], [0], [1], [0, 0, 1, 1], [], []>} : vector<1x5xf32>, vector<5x160xf32>, vector<1x160xf32> -> vector<1x160xf32>
    %35 = vector.broadcast %32 : vector<1x160xf32> to vector<8x160xf32>
    %36 = arith.subf %10, %35 : vector<8x160xf32>
    %37 = vector.broadcast %34 : vector<1x160xf32> to vector<8x160xf32>
    %38 = arith.mulf %36, %37 : vector<8x160xf32>
    %c0_31 = arith.constant 0 : index
    %c0_32 = arith.constant 0 : index
    %39 = vector.load %arg9[%c0_31, %c0_32] : memref<1x160xf32, #tpu.memory_space<vmem>>, vector<1x160xf32>
    %40 = vector.broadcast %39 : vector<1x160xf32> to vector<8x160xf32>
    %41 = arith.mulf %38, %40 : vector<8x160xf32>
    %c0_33 = arith.constant 0 : index
    %c0_34 = arith.constant 0 : index
    %42 = vector.load %arg10[%c0_33, %c0_34] : memref<1x160xf32, #tpu.memory_space<vmem>>, vector<1x160xf32>
    %43 = vector.broadcast %42 : vector<1x160xf32> to vector<8x160xf32>
    %44 = arith.addf %41, %43 : vector<8x160xf32>
    %c0_35 = arith.constant 0 : index
    %c0_36 = arith.constant 0 : index
    %45 = vector.load %arg11[%c0_35, %c0_36] : memref<160x256xf32, #tpu.memory_space<vmem>>, vector<160x256xf32>
    %cst_37 = arith.constant dense<0.000000e+00> : vector<8x256xf32>
    %46 = tpu.matmul %44, %45, %cst_37 {dimension_numbers = #tpu.dot_dimension_numbers<[1], [0], [0], [1], [0, 0, 1, 1], [], []>} : vector<8x160xf32>, vector<160x256xf32>, vector<8x256xf32> -> vector<8x256xf32>
    %c0_38 = arith.constant 0 : index
    %c0_39 = arith.constant 0 : index
    %47 = vector.load %arg12[%c0_38, %c0_39] : memref<1x256xf32, #tpu.memory_space<vmem>>, vector<1x256xf32>
    %48 = vector.broadcast %47 : vector<1x256xf32> to vector<8x256xf32>
    %49 = arith.addf %46, %48 : vector<8x256xf32>
    %cst_40 = arith.constant dense<0.000000e+00> : vector<256xf32>
    %50 = vector.multi_reduction <add>, %49, %cst_40 [0] : vector<8x256xf32> to vector<256xf32>
    %51 = vector.shape_cast %50 : vector<256xf32> to vector<1x256xf32>
    %52 = arith.mulf %49, %49 : vector<8x256xf32>
    %cst_41 = arith.constant dense<0.000000e+00> : vector<256xf32>
    %53 = vector.multi_reduction <add>, %52, %cst_41 [0] : vector<8x256xf32> to vector<256xf32>
    %54 = vector.shape_cast %53 : vector<256xf32> to vector<1x256xf32>
    %c0_42 = arith.constant 0 : index
    %c0_43 = arith.constant 0 : index
    %55 = vector.load %arg13[%c0_42, %c0_43] : memref<256x8xf32, #tpu.memory_space<vmem>>, vector<256x8xf32>
    %cst_44 = arith.constant dense<0.000000e+00> : vector<1x8xf32>
    %56 = tpu.matmul %51, %55, %cst_44 {dimension_numbers = #tpu.dot_dimension_numbers<[1], [0], [0], [1], [0, 0, 1, 1], [], []>} : vector<1x256xf32>, vector<256x8xf32>, vector<1x8xf32> -> vector<1x8xf32>
    %cst_45 = arith.constant 2.560000e+02 : f32
    %57 = vector.broadcast %cst_45 : f32 to vector<1x8xf32>
    %58 = arith.divf %56, %57 : vector<1x8xf32>
    %c0_46 = arith.constant 0 : index
    %c0_47 = arith.constant 0 : index
    %59 = vector.load %arg13[%c0_46, %c0_47] : memref<256x8xf32, #tpu.memory_space<vmem>>, vector<256x8xf32>
    %cst_48 = arith.constant dense<0.000000e+00> : vector<1x8xf32>
    %60 = tpu.matmul %54, %59, %cst_48 {dimension_numbers = #tpu.dot_dimension_numbers<[1], [0], [0], [1], [0, 0, 1, 1], [], []>} : vector<1x256xf32>, vector<256x8xf32>, vector<1x8xf32> -> vector<1x8xf32>
    %cst_49 = arith.constant 2.560000e+02 : f32
    %61 = vector.broadcast %cst_49 : f32 to vector<1x8xf32>
    %62 = arith.divf %60, %61 : vector<1x8xf32>
    %63 = arith.mulf %58, %58 : vector<1x8xf32>
    %64 = arith.subf %62, %63 : vector<1x8xf32>
    %cst_50 = arith.constant 0.000000e+00 : f32
    %65 = vector.broadcast %cst_50 : f32 to vector<1x8xf32>
    %66 = arith.maximumf %64, %65 : vector<1x8xf32>
    %cst_51 = arith.constant 9.99999974E-6 : f32
    %67 = vector.broadcast %cst_51 : f32 to vector<1x8xf32>
    %68 = arith.addf %66, %67 : vector<1x8xf32>
    %69 = math.rsqrt %68 : vector<1x8xf32>
    %c0_52 = arith.constant 0 : index
    %c0_53 = arith.constant 0 : index
    %70 = vector.load %arg14[%c0_52, %c0_53] : memref<8x256xf32, #tpu.memory_space<vmem>>, vector<8x256xf32>
    %cst_54 = arith.constant dense<0.000000e+00> : vector<1x256xf32>
    %71 = tpu.matmul %58, %70, %cst_54 {dimension_numbers = #tpu.dot_dimension_numbers<[1], [0], [0], [1], [0, 0, 1, 1], [], []>} : vector<1x8xf32>, vector<8x256xf32>, vector<1x256xf32> -> vector<1x256xf32>
    %c0_55 = arith.constant 0 : index
    %c0_56 = arith.constant 0 : index
    %72 = vector.load %arg14[%c0_55, %c0_56] : memref<8x256xf32, #tpu.memory_space<vmem>>, vector<8x256xf32>
    %cst_57 = arith.constant dense<0.000000e+00> : vector<1x256xf32>
    %73 = tpu.matmul %69, %72, %cst_57 {dimension_numbers = #tpu.dot_dimension_numbers<[1], [0], [0], [1], [0, 0, 1, 1], [], []>} : vector<1x8xf32>, vector<8x256xf32>, vector<1x256xf32> -> vector<1x256xf32>
    %74 = vector.broadcast %71 : vector<1x256xf32> to vector<8x256xf32>
    %75 = arith.subf %49, %74 : vector<8x256xf32>
    %76 = vector.broadcast %73 : vector<1x256xf32> to vector<8x256xf32>
    %77 = arith.mulf %75, %76 : vector<8x256xf32>
    %c0_58 = arith.constant 0 : index
    %c0_59 = arith.constant 0 : index
    %78 = vector.load %arg15[%c0_58, %c0_59] : memref<1x256xf32, #tpu.memory_space<vmem>>, vector<1x256xf32>
    %79 = vector.broadcast %78 : vector<1x256xf32> to vector<8x256xf32>
    %80 = arith.mulf %77, %79 : vector<8x256xf32>
    %c0_60 = arith.constant 0 : index
    %c0_61 = arith.constant 0 : index
    %81 = vector.load %arg16[%c0_60, %c0_61] : memref<1x256xf32, #tpu.memory_space<vmem>>, vector<1x256xf32>
    %82 = vector.broadcast %81 : vector<1x256xf32> to vector<8x256xf32>
    %83 = arith.addf %80, %82 : vector<8x256xf32>
    %cst_62 = arith.constant 0.000000e+00 : f32
    %84 = vector.broadcast %cst_62 : f32 to vector<8x256xf32>
    %85 = arith.maximumf %83, %84 : vector<8x256xf32>
    %c0_63 = arith.constant 0 : index
    %c0_64 = arith.constant 0 : index
    %86 = vector.load %arg17[%c0_63, %c0_64] : memref<256x32xf32, #tpu.memory_space<vmem>>, vector<256x32xf32>
    %cst_65 = arith.constant dense<0.000000e+00> : vector<8x32xf32>
    %87 = tpu.matmul %85, %86, %cst_65 {dimension_numbers = #tpu.dot_dimension_numbers<[1], [0], [0], [1], [0, 0, 1, 1], [], []>} : vector<8x256xf32>, vector<256x32xf32>, vector<8x32xf32> -> vector<8x32xf32>
    %c0_66 = arith.constant 0 : index
    %c0_67 = arith.constant 0 : index
    %88 = vector.load %arg18[%c0_66, %c0_67] : memref<1x32xf32, #tpu.memory_space<vmem>>, vector<1x32xf32>
    %89 = vector.broadcast %88 : vector<1x32xf32> to vector<8x32xf32>
    %90 = arith.addf %87, %89 : vector<8x32xf32>
    %cst_68 = arith.constant dense<0.000000e+00> : vector<32xf32>
    %91 = vector.multi_reduction <add>, %90, %cst_68 [0] : vector<8x32xf32> to vector<32xf32>
    %92 = vector.shape_cast %91 : vector<32xf32> to vector<1x32xf32>
    %cst_69 = arith.constant 8.000000e+00 : f32
    %93 = vector.broadcast %cst_69 : f32 to vector<1x32xf32>
    %94 = arith.divf %92, %93 : vector<1x32xf32>
    %95 = arith.mulf %90, %90 : vector<8x32xf32>
    %cst_70 = arith.constant dense<0.000000e+00> : vector<32xf32>
    %96 = vector.multi_reduction <add>, %95, %cst_70 [0] : vector<8x32xf32> to vector<32xf32>
    %97 = vector.shape_cast %96 : vector<32xf32> to vector<1x32xf32>
    %cst_71 = arith.constant 8.000000e+00 : f32
    %98 = vector.broadcast %cst_71 : f32 to vector<1x32xf32>
    %99 = arith.divf %97, %98 : vector<1x32xf32>
    %100 = arith.mulf %94, %94 : vector<1x32xf32>
    %101 = arith.subf %99, %100 : vector<1x32xf32>
    %cst_72 = arith.constant 0.000000e+00 : f32
    %102 = vector.broadcast %cst_72 : f32 to vector<1x32xf32>
    %103 = arith.maximumf %101, %102 : vector<1x32xf32>
    %104 = vector.broadcast %94 : vector<1x32xf32> to vector<8x32xf32>
    %105 = arith.subf %90, %104 : vector<8x32xf32>
    %cst_73 = arith.constant 9.99999974E-6 : f32
    %106 = vector.broadcast %cst_73 : f32 to vector<1x32xf32>
    %107 = arith.addf %103, %106 : vector<1x32xf32>
    %108 = math.rsqrt %107 : vector<1x32xf32>
    %109 = vector.broadcast %108 : vector<1x32xf32> to vector<8x32xf32>
    %110 = arith.mulf %105, %109 : vector<8x32xf32>
    %c0_74 = arith.constant 0 : index
    %c0_75 = arith.constant 0 : index
    %111 = vector.load %arg19[%c0_74, %c0_75] : memref<1x32xf32, #tpu.memory_space<vmem>>, vector<1x32xf32>
    %112 = vector.broadcast %111 : vector<1x32xf32> to vector<8x32xf32>
    %113 = arith.mulf %110, %112 : vector<8x32xf32>
    %c0_76 = arith.constant 0 : index
    %c0_77 = arith.constant 0 : index
    %114 = vector.load %arg20[%c0_76, %c0_77] : memref<1x32xf32, #tpu.memory_space<vmem>>, vector<1x32xf32>
    %115 = vector.broadcast %114 : vector<1x32xf32> to vector<8x32xf32>
    %116 = arith.addf %113, %115 : vector<8x32xf32>
    %cst_78 = arith.constant 0.000000e+00 : f32
    %117 = vector.broadcast %cst_78 : f32 to vector<8x32xf32>
    %118 = arith.maximumf %116, %117 : vector<8x32xf32>
    %c0_79 = arith.constant 0 : index
    %c0_80 = arith.constant 0 : index
    %119 = vector.load %arg21[%c0_79, %c0_80] : memref<8x32xf32, #tpu.memory_space<vmem>>, vector<8x32xf32>
    tpu.vector_store %arg21[%c0_79, %c0_80], %118 {strides = array<i32>} : memref<8x32xf32, #tpu.memory_space<vmem>>, vector<8x32xf32>,
    return
  }
}

</mosaic_0001>

<bundles_post_ra>
// kernel: se_conv_trans_e_forward.3
= control target key start
LH: loop header
LB: loop body
LE: loop exit
PB: predicated region body
PF: predicated region fallthrough
CT: control target
= control target key end

     0   :  { %7 = vsyncpa [#allocation3], 0  ;;  %s655_s0 = inlined_call_operand.hbm [shape: f32[8,32], index: 0, kind: input, shape index: {}]   ;;  %s656_s1 = inlined_call_operand.hbm [shape: f32[256,32], index: 1, kind: input, shape index: {}]   ;;  %s657_s2 = inlined_call_operand.hbm [shape: f32[8,256], index: 2, kind: output, shape index: {}]  }
   0x1   :  { %8 = vsyncpa [#allocation6], 0 }
   0x2   :  { %9 = vsyncpa [#allocation4], 0  ;;  %s548_s9 = smov [#allocation2]   ;;  %s549_s11 = smov [#allocation5]  }
   0x3   :  { %s16_s10 = sshll.u32 %s548_s9, 4  ;;  %s25_s12 = sshll.u32 %s549_s11, 4  ;;  %s17_s10 = int_to_ptr.vmem [resolvable:$true] %s16_s10  ;;  %s568_s12 = int_to_ptr.vmem [resolvable:$true] %s25_s12 }
   0x4   :  { %s476_s15 = scalar_lea.hbm %s655_s0, 128 }
   0x5   :  { %p477_p0 = scmp.ne.s32.totalorder %s655_s0, %s476_s15  ;;  %p480_p1 = scmp.lt.u32.totalorder %s476_s15, %s655_s0 }
   0x7   :  { %p482_p2 = pnand %p480_p1, %p477_p0 }
   0x9   :  { %485 = shalt.err (!%p482_p2)
}
   0xa   :  { %s486_s20 = scalar_lea.vmem %s17_s10, 128  ;;  %p491_p4 = scmp.lt.s32.totalorder %s17_s10, %s17_s10 }
   0xb   :  { %p487_p3 = scmp.ne.s32.totalorder %s17_s10, %s486_s20  ;;  %p492_p5 = scmp.lt.s32.totalorder %s486_s20, %s486_s20 }
   0xd   :  { %p493_p6 = por %p492_p5, %p491_p4 }
   0xf   :  { %p494_p7 = pnand %p493_p6, %p487_p3 }
  0x11   :  { %497 = shalt.err (!%p494_p7)
}
  0x12   :  { %19 = dma.hbm_to_vmem [thread:$0]  %s655_s0, 128, %s17_s10, [#allocation3]  }
  0x13   :  { %s498_s25 = scalar_lea.hbm %s656_s1, 4096 }
  0x14   :  { %p499_p8 = scmp.ne.s32.totalorder %s656_s1, %s498_s25  ;;  %p502_p9 = scmp.lt.u32.totalorder %s498_s25, %s656_s1 }
  0x16   :  { %p504_p10 = pnand %p502_p9, %p499_p8 }
  0x18   :  { %507 = shalt.err (!%p504_p10)
}
  0x19   :  { %s508_s30 = scalar_lea.vmem %s568_s12, 4096  ;;  %p513_p12 = scmp.lt.s32.totalorder %s568_s12, %s568_s12 }
  0x1a   :  { %p509_p11 = scmp.ne.s32.totalorder %s568_s12, %s508_s30  ;;  %p514_p13 = scmp.lt.s32.totalorder %s508_s30, %s508_s30 }
  0x1c   :  { %p515_p0 = por %p514_p13, %p513_p12 }
  0x1e   :  { %p516_p1 = pnand %p515_p0, %p509_p11 }
  0x20   :  { %519 = shalt.err (!%p516_p1)
}
  0x21   :  { %s550_s0 = smov 128   ;;  %s551_s3 = smov 8  }
  0x22   :  { %31 = dma.hbm_to_vmem [thread:$0]  %s656_s1, 4096, %s568_s12, [#allocation6], %s550_s0, %s550_s0, %s551_s3  }
  0x23   :  { %542 = dma.done.wait [#allocation3], 128  }
  0x24   :  { %543 = vsyncadd [#allocation3], 4294967168 }
  0x25   :  { %544 = dma.done.wait [#allocation6], 4096  }
  0x26   :  { %545 = vsyncadd [#allocation6], 4294963200  ;;  %v54_v0 = vld [vmem:[#allocation5 + $0x80] sm:$0xff]  ;;  %v55_v1 = vld [vmem:[#allocation5 + $0x88] sm:$0xff]  ;;  %vm103_vm0 = vcmask 261120   ;;  %s552_s1 = smov [#allocation7]  }
  0x27   :  { %v38_v2 = vld [vmem:[#allocation5] sm:$0xff]  ;;  %412 = vtanh.f32 %v54_v0  ;;  %v39_v3 = vld [vmem:[#allocation5 + $0x8] sm:$0xff]  ;;  %v56_v4 = vld [vmem:[#allocation5 + $0x90] sm:$0xff]  ;;  %s282_s6 = sshll.u32 %s552_s1, 4  ;;  %s283_s6 = int_to_ptr.vmem [resolvable:$true] %s282_s6 }
  0x28   :  { %414 = vtanh.f32 %v55_v1  ;;  %v57_v5 = vld [vmem:[#allocation5 + $0x98] sm:$0xff]  ;;  %v40_v6 = vld [vmem:[#allocation5 + $0x10] sm:$0xff]  ;;  %v58_v8 = vld [vmem:[#allocation5 + $0xa0] sm:$0xff]  ;;  %s520_s7 = scalar_lea.vmem %s283_s6, 256  ;;  %p525_p3 = scmp.lt.s32.totalorder %s283_s6, %s283_s6 }
  0x29   :  { %416 = vtanh.f32 %v38_v2  ;;  %v41_v7 = vld [vmem:[#allocation5 + $0x18] sm:$0xff]  ;;  %v59_v9 = vld [vmem:[#allocation5 + $0xa8] sm:$0xff]  ;;  %v42_v12 = vld [vmem:[#allocation5 + $0x20] sm:$0xff]  ;;  %p521_p2 = scmp.ne.s32.totalorder %s283_s6, %s520_s7  ;;  %p526_p4 = scmp.lt.s32.totalorder %s520_s7, %s520_s7 }
  0x2a   :  { %418 = vtanh.f32 %v39_v3  ;;  %v599_v10 = vld [vmem:[#allocation2] sm:$0xff]  ;;  %vm605_vm1 = vmpackc.low %vm103_vm0, %vm103_vm0  ;;  %v43_v15 = vld [vmem:[#allocation5 + $0x28] sm:$0xff] }
  0x2b   :  { %420 = vtanh.f32 %v56_v4  ;;  %357 = vmatprep.mubr.msk.f32.mxu0 %vm103_vm0, %v599_v10  ;;  %v60_v18 = vld [vmem:[#allocation5 + $0xb0] sm:$0xff]  ;;  %v61_v20 = vld [vmem:[#allocation5 + $0xb8] sm:$0xff]  ;;  %v62_v32 = vld [vmem:[#allocation5 + $0xc0] sm:$0xff]  ;;  %p527_p5 = por %p526_p4, %p525_p3 }
  0x2c   :  { %422 = vtanh.f32 %v57_v5  ;;  %v44_v28 = vld [vmem:[#allocation5 + $0x30] sm:$0xff]  ;;  %v45_v30 = vld [vmem:[#allocation5 + $0x38] sm:$0xff]  ;;  %v63_v34 = vld [vmem:[#allocation5 + $0xc8] sm:$0xff] }
  0x2d   :  { %424 = vtanh.f32 %v40_v6  ;;  %v46_v39 = vld [vmem:[#allocation5 + $0x40] sm:$0xff]  ;;  %v47_v40 = vld [vmem:[#allocation5 + $0x48] sm:$0xff]  ;;  %v64_v42 = vld [vmem:[#allocation5 + $0xd0] sm:$0xff]  ;;  %p528_p6 = pnand %p527_p5, %p521_p2 }
  0x2e   :  { %426 = vtanh.f32 %v41_v7  ;;  %v65_v44 = vld [vmem:[#allocation5 + $0xd8] sm:$0xff]  ;;  %v48_v49 = vld [vmem:[#allocation5 + $0x50] sm:$0xff]  ;;  %v66_v52 = vld [vmem:[#allocation5 + $0xe0] sm:$0xff] }
  0x2f   :  { %428 = vtanh.f32 %v58_v8  ;;  %v49_v50 = vld [vmem:[#allocation5 + $0x58] sm:$0xff]  ;;  %v67_v54 = vld [vmem:[#allocation5 + $0xe8] sm:$0xff]  ;;  %v50_v59 = vld [vmem:[#allocation5 + $0x60] sm:$0xff] }
  0x30   :  { %430 = vtanh.f32 %v59_v9  ;;  %v51_v60 = vld [vmem:[#allocation5 + $0x68] sm:$0xff]  ;;  %v68_v62 = vld [vmem:[#allocation5 + $0xf0] sm:$0xff]  ;;  %v69_v0 = vld [vmem:[#allocation5 + $0xf8] sm:$0xff] }
  0x31   :  { %v413_v11 = vpop.eup %412  ;;  %432 = vtanh.f32 %v42_v12  ;;  %v52_v5 = vld [vmem:[#allocation5 + $0x70] sm:$0xff]  ;;  %v53_v7 = vld [vmem:[#allocation5 + $0x78] sm:$0xff] }
  0x32   :  { %v415_v13 = vpop.eup %414  ;;  %434 = vtanh.f32 %v43_v15 }
  0x33   :  { %v417_v16 = vpop.eup %416  ;;  %v359_v17 = vpack.c.bf16 %v415_v13, %v413_v11  ;;  %436 = vtanh.f32 %v60_v18 }
  0x34   :  { %v419_v19 = vpop.eup %418  ;;  %438 = vtanh.f32 %v61_v20 }
  0x35   :  { %v421_v21 = vpop.eup %420  ;;  %361 = vmatprep.subr.msk.bf16.mxu0 %vm605_vm1, %v359_v17  ;;  %v362_v22 = vpack.c.bf16 %v419_v19, %v417_v16  ;;  %440 = vtanh.f32 %v44_v28 }
  0x36   :  { %v423_v23 = vpop.eup %422  ;;  %442 = vtanh.f32 %v45_v30 }
  0x37   :  { %v425_v24 = vpop.eup %424  ;;  %364 = vmatpush3.bf16.xpose.msk.msra.mxu0 %vm605_vm1, %v362_v22  ;;  %v365_v25 = vpack.c.bf16 %v423_v23, %v421_v21  ;;  %444 = vtanh.f32 %v62_v32 }
  0x38   :  { %v427_v26 = vpop.eup %426  ;;  %446 = vtanh.f32 %v63_v34 }
  0x39   :  { %v429_v27 = vpop.eup %428  ;;  %367 = vmatprep.subr.msk.bf16.mxu0 %vm605_vm1, %v365_v25  ;;  %v368_v31 = vpack.c.bf16 %v427_v26, %v425_v24  ;;  %448 = vtanh.f32 %v46_v39 }
  0x3a   :  { %v431_v29 = vpop.eup %430  ;;  %450 = vtanh.f32 %v47_v40 }
  0x3b   :  { %v371_v33 = vpack.c.bf16 %v431_v29, %v429_v27  ;;  %v433_v35 = vpop.eup %432  ;;  %452 = vtanh.f32 %v64_v42 }
  0x3c   :  { %v435_v36 = vpop.eup %434  ;;  %454 = vtanh.f32 %v65_v44 }
  0x3d   :  { %v437_v37 = vpop.eup %436  ;;  %v374_v41 = vpack.c.bf16 %v435_v36, %v433_v35  ;;  %456 = vtanh.f32 %v48_v49 }
  0x3e   :  { %v439_v38 = vpop.eup %438  ;;  %458 = vtanh.f32 %v49_v50 }
  0x3f   :  { %370 = vmatpush3.bf16.xpose.msk.msra.mxu0 %vm605_vm1, %v368_v31  ;;  %v377_v43 = vpack.c.bf16 %v439_v38, %v437_v37  ;;  %v441_v45 = vpop.eup %440  ;;  %460 = vtanh.f32 %v66_v52 }
  0x40   :  { %373 = vmatprep.subr.msk.bf16.mxu0 %vm605_vm1, %v371_v33  ;;  %v443_v46 = vpop.eup %442  ;;  %462 = vtanh.f32 %v67_v54 }
  0x41   :  { %v445_v47 = vpop.eup %444  ;;  %v380_v51 = vpack.c.bf16 %v443_v46, %v441_v45  ;;  %464 = vtanh.f32 %v50_v59 }
  0x42   :  { %v447_v48 = vpop.eup %446  ;;  %466 = vtanh.f32 %v51_v60 }
  0x43   :  { %v383_v53 = vpack.c.bf16 %v447_v48, %v445_v47  ;;  %v449_v55 = vpop.eup %448  ;;  %468 = vtanh.f32 %v68_v62 }
  0x44   :  { %v451_v56 = vpop.eup %450  ;;  %470 = vtanh.f32 %v69_v0 }
  0x45   :  { %v453_v57 = vpop.eup %452  ;;  %v386_v61 = vpack.c.bf16 %v451_v56, %v449_v55  ;;  %472 = vtanh.f32 %v52_v5 }
  0x46   :  { %v455_v58 = vpop.eup %454  ;;  %474 = vtanh.f32 %v53_v7 }
  0x47   :  { %376 = vmatpush3.bf16.xpose.msk.msra.mxu0 %vm605_vm1, %v374_v41  ;;  %v389_v63 = vpack.c.bf16 %v455_v58, %v453_v57  ;;  %v457_v1 = vpop.eup %456 }
  0x48   :  { %379 = vmatprep.subr.msk.bf16.mxu0 %vm605_vm1, %v377_v43  ;;  %v459_v2 = vpop.eup %458 }
  0x49   :  { %v461_v3 = vpop.eup %460  ;;  %v392_v6 = vpack.c.bf16 %v459_v2, %v457_v1 }
  0x4a   :  { %v463_v4 = vpop.eup %462 }
  0x4b   :  { %v395_v8 = vpack.c.bf16 %v463_v4, %v461_v3  ;;  %v465_v9 = vpop.eup %464 }
  0x4c   :  { %v467_v11 = vpop.eup %466 }
  0x4d   :  { %v469_v12 = vpop.eup %468  ;;  %v398_v15 = vpack.c.bf16 %v467_v11, %v465_v9 }
  0x4e   :  { %v471_v13 = vpop.eup %470 }
  0x4f   :  { %382 = vmatpush3.bf16.xpose.msk.msra.mxu0 %vm605_vm1, %v380_v51  ;;  %v401_v16 = vpack.c.bf16 %v471_v13, %v469_v12  ;;  %v473_v17 = vpop.eup %472 }
  0x50   :  { %385 = vmatprep.subr.msk.bf16.mxu0 %vm605_vm1, %v383_v53  ;;  %v475_v18 = vpop.eup %474 }
  0x51   :  { %v404_v19 = vpack.c.bf16 %v475_v18, %v473_v17 }
  0x57   :  { %388 = vmatpush3.bf16.xpose.msk.msra.mxu0 %vm605_vm1, %v386_v61 }
  0x58   :  { %391 = vmatprep.subr.msk.bf16.mxu0 %vm605_vm1, %v389_v63 }
  0x5f   :  { %394 = vmatpush3.bf16.xpose.msk.msra.mxu0 %vm605_vm1, %v392_v6 }
  0x60   :  { %397 = vmatprep.subr.msk.bf16.mxu0 %vm605_vm1, %v395_v8 }
  0x67   :  { %400 = vmatpush3.bf16.xpose.msk.msra.mxu0 %vm605_vm1, %v398_v15 }
  0x68   :  { %403 = vmatprep.subr.msk.bf16.mxu0 %vm605_vm1, %v401_v16 }
  0x6f   :  { %406 = vmatpush3.bf16.xpose.msk.msra.mxu0 %vm605_vm1, %v404_v19 }
  0x76   :  { %358 = vmatmul.mubr.msk.f32.vlgmr.msra.gmra.mrb[0].mxu0 %vm103_vm0, %v599_v10 }
 0x149   :  { %v269_v20 = vpop.f32.mrb[0].mxu0 }
 0x14a   :  { %274 = vst [vmem:[#allocation7] sm:$0xff] %v269_v20  ;;  %v271_v21 = vpop.f32.mrb[1].mxu0 }
 0x14b   :  { %275 = vst [vmem:[#allocation7 + $0x8] sm:$0xff] %v271_v21 }
 0x14c   :  { %531 = shalt.err (!%p528_p6)
}
 0x14d   :  { %s532_s10 = scalar_lea.hbm %s657_s2, 256 }
 0x14e   :  { %p533_p7 = scmp.ne.s32.totalorder %s657_s2, %s532_s10  ;;  %p536_p8 = scmp.lt.u32.totalorder %s532_s10, %s657_s2 }
 0x150   :  { %p538_p9 = pnand %p536_p8, %p533_p7 }
 0x152   :  { %541 = shalt.err (!%p538_p9)
}
 0x153   :  { %285 = dma.vmem_to_hbm [thread:$0]  %s283_s6, 256, %s657_s2, [#allocation4]  }
 0x154   :  { %546 = dma.done.wait [#allocation4], 256  }
 0x155   :  { %547 = vsyncadd [#allocation4], 4294967040 }
 0x156   :  { %289 = vsyncpa [#allocation3], 1 }
 0x157   :  { %290 = vsyncpa [#allocation6], 1 }
 0x158   :  { %291 = vsyncpa [#allocation4], 1 }

// kernel: se_conv_trans_e_forward.2
= control target key start
LH: loop header
LB: loop body
LE: loop exit
PB: predicated region body
PF: predicated region fallthrough
CT: control target
= control target key end

     0   :  { %s2970_s0 = inlined_call_operand.hbm [shape: f32[8,32], index: 0, kind: input, shape index: {}]   ;;  %s2971_s1 = inlined_call_operand.hbm [shape: f32[8,32], index: 1, kind: input, shape index: {}]   ;;  %s2972_s2 = inlined_call_operand.hbm [shape: f32[8,32], index: 2, kind: input, shape index: {}]   ;;  %s2973_s3 = inlined_call_operand.hbm [shape: f32[8,32], index: 3, kind: input, shape index: {}]   ;;  %s2974_s4 = inlined_call_operand.hbm [shape: f32[8,16], index: 4, kind: input, shape index: {}]   ;;  %s2975_s5 = inlined_call_operand.hbm [shape: f32[16,32], index: 5, kind: input, shape index: {}]   ;;  %s2976_s6 = inlined_call_operand.hbm [shape: f32[1,32], index: 6, kind: input, shape index: {}]   ;;  %s2977_s7 = inlined_call_operand.hbm [shape: f32[160,5], index: 7, kind: input, shape index: {}]   ;;  %s2978_s8 = inlined_call_operand.hbm [shape: f32[5,160], index: 8, kind: input, shape index: {}]   ;;  %s2979_s9 = inlined_call_operand.hbm [shape: f32[1,160], index: 9, kind: input, shape index: {}]   ;;  %s2980_s10 = inlined_call_operand.hbm [shape: f32[1,160], index: 10, kind: input, shape index: {}]   ;;  %s2981_s11 = inlined_call_operand.hbm [shape: f32[160,256], index: 11, kind: input, shape index: {}]   ;;  %s2982_s12 = inlined_call_operand.hbm [shape: f32[1,256], index: 12, kind: input, shape index: {}]   ;;  %s2983_s13 = inlined_call_operand.hbm [shape: f32[256,8], index: 13, kind: input, shape index: {}]   ;;  %s2984_s14 = inlined_call_operand.hbm [shape: f32[8,256], index: 14, kind: input, shape index: {}]   ;;  %s2985_s15 = inlined_call_operand.hbm [shape: f32[1,256], index: 15, kind: input, shape index: {}]   ;;  %s2986_s16 = inlined_call_operand.hbm [shape: f32[1,256], index: 16, kind: input, shape index: {}]   ;;  %s2987_s17 = inlined_call_operand.hbm [shape: f32[256,32], index: 17, kind: input, shape index: {}]   ;;  %s2988_s18 = inlined_call_operand.hbm [shape: f32[1,32], index: 18, kind: input, shape index: {}]   ;;  %s2989_s19 = inlined_call_operand.hbm [shape: f32[1,32], index: 19, kind: input, shape index: {}]   ;;  %s2990_s20 = inlined_call_operand.hbm [shape: f32[1,32], index: 20, kind: input, shape index: {}]   ;;  %s2991_s21 = inlined_call_operand.hbm [shape: f32[8,32], index: 21, kind: output, shape index: {}]  }
   0x1   :  { %3000 = sst [smem:[#allocation48_spill]] %s2970_s0 }
   0x2   :  { %3001 = sst [smem:[#allocation49_spill]] %s2971_s1 }
   0x3   :  { %3002 = sst [smem:[#allocation50_spill]] %s2972_s2 }
   0x4   :  { %3003 = sst [smem:[#allocation51_spill]] %s2973_s3 }
   0x5   :  { %3004 = sst [smem:[#allocation52_spill]] %s2974_s4 }
   0x6   :  { %3005 = sst [smem:[#allocation53_spill]] %s2975_s5 }
   0x7   :  { %3006 = sst [smem:[#allocation54_spill]] %s2990_s20 }
   0x8   :  { %3007 = sst [smem:[#allocation55_spill]] %s2991_s21 }
   0x9   :  { %26 = vsyncpa [#allocation3], 0 }
   0xa   :  { %27 = vsyncpa [#allocation6], 0 }
   0xb   :  { %28 = vsyncpa [#allocation9], 0 }
   0xc   :  { %29 = vsyncpa [#allocation12], 0 }
   0xd   :  { %30 = vsyncpa [#allocation15], 0 }
   0xe   :  { %31 = vsyncpa [#allocation18], 0 }
   0xf   :  { %32 = vsyncpa [#allocation21], 0 }
  0x10   :  { %33 = vsyncpa [#allocation24], 0 }
  0x11   :  { %34 = vsyncpa [#allocation27], 0 }
  0x12   :  { %35 = vsyncpa [#allocation30], 0 }
  0x13   :  { %36 = vsyncpa [#allocation33], 0 }
  0x14   :  { %37 = vsyncpa [#allocation4], 0  ;;  %s2420_s2 = smov [#allocation5]   ;;  %s2421_s26 = smov [#allocation8]  }
  0x15   :  { %s54_s25 = sshll.u32 %s2420_s2, 4  ;;  %s74_s27 = sshll.u32 %s2421_s26, 4  ;;  %s55_s25 = int_to_ptr.vmem [resolvable:$true] %s54_s25  ;;  %s75_s27 = int_to_ptr.vmem [resolvable:$true] %s74_s27 }
  0x16   :  { %s3008_s29 = sld [smem:[#allocation49_spill]] }
  0x1c   :  { %s1912_s0 = scalar_lea.hbm %s3008_s29, 128 }
  0x1d   :  { %p1913_p0 = scmp.ne.s32.totalorder %s3008_s29, %s1912_s0  ;;  %p1916_p1 = scmp.lt.u32.totalorder %s1912_s0, %s3008_s29 }
  0x1f   :  { %p1918_p2 = pnand %p1916_p1, %p1913_p0 }
  0x21   :  { %1921 = shalt.err (!%p1918_p2)
}
  0x22   :  { %s1922_s23 = scalar_lea.vmem %s55_s25, 128  ;;  %p1927_p4 = scmp.lt.s32.totalorder %s55_s25, %s55_s25 }
  0x23   :  { %p1923_p3 = scmp.ne.s32.totalorder %s55_s25, %s1922_s23  ;;  %p1928_p5 = scmp.lt.s32.totalorder %s1922_s23, %s1922_s23 }
  0x25   :  { %p1929_p6 = por %p1928_p5, %p1927_p4 }
  0x27   :  { %p1930_p7 = pnand %p1929_p6, %p1923_p3 }
  0x29   :  { %1933 = shalt.err (!%p1930_p7)
}
  0x2a   :  { %57 = dma.hbm_to_vmem [thread:$0]  %s3008_s29, 128, %s55_s25, [#allocation6]  }
  0x2b   :  { %s3009_s3 = sld [smem:[#allocation51_spill]] }
  0x31   :  { %s1934_s28 = scalar_lea.hbm %s3009_s3, 128 }
  0x32   :  { %p1935_p8 = scmp.ne.s32.totalorder %s3009_s3, %s1934_s28  ;;  %p1938_p9 = scmp.lt.u32.totalorder %s1934_s28, %s3009_s3 }
  0x34   :  { %p1940_p10 = pnand %p1938_p9, %p1935_p8 }
  0x36   :  { %1943 = shalt.err (!%p1940_p10)
}
  0x37   :  { %s1944_s22 = scalar_lea.vmem %s75_s27, 128  ;;  %p1949_p12 = scmp.lt.s32.totalorder %s75_s27, %s75_s27 }
  0x38   :  { %p1945_p11 = scmp.ne.s32.totalorder %s75_s27, %s1944_s22  ;;  %p1950_p13 = scmp.lt.s32.totalorder %s1944_s22, %s1944_s22 }
  0x3a   :  { %p1951_p0 = por %p1950_p13, %p1949_p12 }
  0x3c   :  { %p1952_p1 = pnand %p1951_p0, %p1945_p11 }
  0x3e   :  { %1955 = shalt.err (!%p1952_p1)
}
  0x3f   :  { %77 = dma.hbm_to_vmem [thread:$0]  %s3009_s3, 128, %s75_s27, [#allocation9]  }
  0x40   :  { %s2422_s23 = smov [#allocation11]   ;;  %s3010_s26 = sld [smem:[#allocation53_spill]] }
  0x41   :  { %s93_s1 = sshll.u32 %s2422_s23, 4  ;;  %s94_s1 = int_to_ptr.vmem [resolvable:$true] %s93_s1 }
  0x46   :  { %s1956_s28 = scalar_lea.hbm %s3010_s26, 256 }
  0x47   :  { %p1957_p2 = scmp.ne.s32.totalorder %s3010_s26, %s1956_s28  ;;  %p1960_p3 = scmp.lt.u32.totalorder %s1956_s28, %s3010_s26 }
  0x49   :  { %p1962_p4 = pnand %p1960_p3, %p1957_p2 }
  0x4b   :  { %1965 = shalt.err (!%p1962_p4)
}
  0x4c   :  { %s1966_s22 = scalar_lea.vmem %s94_s1, 256  ;;  %p1971_p6 = scmp.lt.s32.totalorder %s94_s1, %s94_s1 }
  0x4d   :  { %p1967_p5 = scmp.ne.s32.totalorder %s94_s1, %s1966_s22  ;;  %p1972_p7 = scmp.lt.s32.totalorder %s1966_s22, %s1966_s22 }
  0x4f   :  { %p1973_p8 = por %p1972_p7, %p1971_p6 }
  0x51   :  { %p1974_p9 = pnand %p1973_p8, %p1967_p5 }
  0x53   :  { %1977 = shalt.err (!%p1974_p9)
}
  0x54   :  { %s2423_s27 = smov 128   ;;  %s2424_s3 = smov 8  }
  0x55   :  { %99 = dma.hbm_to_vmem [thread:$0]  %s3010_s26, 256, %s94_s1, [#allocation12], %s2423_s27, %s2423_s27, %s2424_s3  }
  0x56   :  { %s2425_s23 = smov [#allocation14]   ;;  %s2426_s2 = smov [#allocation17]  }
  0x57   :  { %s115_s24 = sshll.u32 %s2425_s23, 4  ;;  %s138_s28 = sshll.u32 %s2426_s2, 4  ;;  %s116_s24 = int_to_ptr.vmem [resolvable:$true] %s115_s24  ;;  %s139_s28 = int_to_ptr.vmem [resolvable:$true] %s138_s28 }
  0x58   :  { %s1978_s0 = scalar_lea.hbm %s2977_s7, 2560 }
  0x59   :  { %p1979_p10 = scmp.ne.s32.totalorder %s2977_s7, %s1978_s0  ;;  %p1982_p11 = scmp.lt.u32.totalorder %s1978_s0, %s2977_s7 }
  0x5b   :  { %p1984_p12 = pnand %p1982_p11, %p1979_p10 }
  0x5d   :  { %1987 = shalt.err (!%p1984_p12)
}
  0x5e   :  { %s1988_s1 = scalar_lea.vmem %s116_s24, 2560  ;;  %p1993_p0 = scmp.lt.s32.totalorder %s116_s24, %s116_s24 }
  0x5f   :  { %p1989_p13 = scmp.ne.s32.totalorder %s116_s24, %s1988_s1  ;;  %p1994_p1 = scmp.lt.s32.totalorder %s1988_s1, %s1988_s1 }
  0x61   :  { %p1995_p2 = por %p1994_p1, %p1993_p0 }
  0x63   :  { %p1996_p3 = pnand %p1995_p2, %p1989_p13 }
  0x65   :  { %1999 = shalt.err (!%p1996_p3)
}
  0x66   :  { %121 = dma.hbm_to_vmem [thread:$0]  %s2977_s7, 2560, %s116_s24, [#allocation15], %s2423_s27, %s2423_s27, %s2424_s3  }
  0x67   :  { %s2000_s21 = scalar_lea.hbm %s2979_s9, 32 }
  0x68   :  { %p2001_p4 = scmp.ne.s32.totalorder %s2979_s9, %s2000_s21  ;;  %p2004_p5 = scmp.lt.u32.totalorder %s2000_s21, %s2979_s9 }
  0x6a   :  { %p2006_p6 = pnand %p2004_p5, %p2001_p4 }
  0x6c   :  { %2009 = shalt.err (!%p2006_p6)
}
  0x6d   :  { %s2010_s0 = scalar_lea.vmem %s139_s28, 32  ;;  %p2015_p8 = scmp.lt.s32.totalorder %s139_s28, %s139_s28 }
  0x6e   :  { %p2011_p7 = scmp.ne.s32.totalorder %s139_s28, %s2010_s0  ;;  %p2016_p9 = scmp.lt.s32.totalorder %s2010_s0, %s2010_s0 }
  0x70   :  { %p2017_p10 = por %p2016_p9, %p2015_p8 }
  0x72   :  { %p2018_p11 = pnand %p2017_p10, %p2011_p7 }
  0x74   :  { %2021 = shalt.err (!%p2018_p11)
}
  0x75   :  { %141 = dma.hbm_to_vmem [thread:$0]  %s2979_s9, 32, %s139_s28, [#allocation18]  }
  0x76   :  { %s2427_s5 = smov [#allocation20]   ;;  %s2022_s25 = scalar_lea.hbm %s2981_s11, 5120 }
  0x77   :  { %s157_s22 = sshll.u32 %s2427_s5, 4  ;;  %p2023_p12 = scmp.ne.s32.totalorder %s2981_s11, %s2022_s25  ;;  %s158_s22 = int_to_ptr.vmem [resolvable:$true] %s157_s22 }
  0x78   :  { %p2026_p13 = scmp.lt.u32.totalorder %s2022_s25, %s2981_s11 }
  0x7a   :  { %p2028_p0 = pnand %p2026_p13, %p2023_p12 }
  0x7c   :  { %2031 = shalt.err (!%p2028_p0)
}
  0x7d   :  { %s2032_s2 = scalar_lea.vmem %s158_s22, 5120  ;;  %p2037_p2 = scmp.lt.s32.totalorder %s158_s22, %s158_s22 }
  0x7e   :  { %p2033_p1 = scmp.ne.s32.totalorder %s158_s22, %s2032_s2  ;;  %p2038_p3 = scmp.lt.s32.totalorder %s2032_s2, %s2032_s2 }
  0x80   :  { %p2039_p4 = por %p2038_p3, %p2037_p2 }
  0x82   :  { %p2040_p5 = pnand %p2039_p4, %p2033_p1 }
  0x84   :  { %2043 = shalt.err (!%p2040_p5)
}
  0x85   :  { %s2428_s9 = smov 256   ;;  %s2429_s28 = smov 16  }
  0x86   :  { %163 = dma.hbm_to_vmem [thread:$0]  %s2981_s11, 5120, %s158_s22, [#allocation21], %s2428_s9, %s2428_s9, %s2429_s28  }
  0x87   :  { %s2430_s0 = smov [#allocation23]   ;;  %s2431_s24 = smov [#allocation26]  }
  0x88   :  { %s179_s7 = sshll.u32 %s2430_s0, 4  ;;  %s202_s5 = sshll.u32 %s2431_s24, 4  ;;  %s180_s7 = int_to_ptr.vmem [resolvable:$true] %s179_s7  ;;  %s203_s5 = int_to_ptr.vmem [resolvable:$true] %s202_s5 }
  0x89   :  { %s2044_s25 = scalar_lea.hbm %s2983_s13, 4096 }
  0x8a   :  { %p2045_p6 = scmp.ne.s32.totalorder %s2983_s13, %s2044_s25  ;;  %p2048_p7 = scmp.lt.u32.totalorder %s2044_s25, %s2983_s13 }
  0x8c   :  { %p2050_p8 = pnand %p2048_p7, %p2045_p6 }
  0x8e   :  { %2053 = shalt.err (!%p2050_p8)
}
  0x8f   :  { %s2054_s11 = scalar_lea.vmem %s180_s7, 4096  ;;  %p2059_p10 = scmp.lt.s32.totalorder %s180_s7, %s180_s7 }
  0x90   :  { %p2055_p9 = scmp.ne.s32.totalorder %s180_s7, %s2054_s11  ;;  %p2060_p11 = scmp.lt.s32.totalorder %s2054_s11, %s2054_s11 }
  0x92   :  { %p2061_p12 = por %p2060_p11, %p2059_p10 }
  0x94   :  { %p2062_p13 = pnand %p2061_p12, %p2055_p9 }
  0x96   :  { %2065 = shalt.err (!%p2062_p13)
}
  0x97   :  { %185 = dma.hbm_to_vmem [thread:$0]  %s2983_s13, 4096, %s180_s7, [#allocation24], %s2423_s27, %s2423_s27, %s2424_s3  }
  0x98   :  { %s2066_s4 = scalar_lea.hbm %s2985_s15, 32 }
  0x99   :  { %p2067_p0 = scmp.ne.s32.totalorder %s2985_s15, %s2066_s4  ;;  %p2070_p1 = scmp.lt.u32.totalorder %s2066_s4, %s2985_s15 }
  0x9b   :  { %p2072_p2 = pnand %p2070_p1, %p2067_p0 }
  0x9d   :  { %2075 = shalt.err (!%p2072_p2)
}
  0x9e   :  { %s2076_s26 = scalar_lea.vmem %s203_s5, 32  ;;  %p2081_p4 = scmp.lt.s32.totalorder %s203_s5, %s203_s5 }
  0x9f   :  { %p2077_p3 = scmp.ne.s32.totalorder %s203_s5, %s2076_s26  ;;  %p2082_p5 = scmp.lt.s32.totalorder %s2076_s26, %s2076_s26 }
  0xa1   :  { %p2083_p6 = por %p2082_p5, %p2081_p4 }
  0xa3   :  { %p2084_p7 = pnand %p2083_p6, %p2077_p3 }
  0xa5   :  { %2087 = shalt.err (!%p2084_p7)
}
  0xa6   :  { %205 = dma.hbm_to_vmem [thread:$0]  %s2985_s15, 32, %s203_s5, [#allocation27]  }
  0xa7   :  { %s2432_s25 = smov [#allocation29]   ;;  %s2433_s20 = smov [#allocation32]  }
  0xa8   :  { %s221_s29 = sshll.u32 %s2432_s25, 4  ;;  %s244_s21 = sshll.u32 %s2433_s20, 4  ;;  %s222_s29 = int_to_ptr.vmem [resolvable:$true] %s221_s29  ;;  %s245_s21 = int_to_ptr.vmem [resolvable:$true] %s244_s21 }
  0xa9   :  { %s2088_s22 = scalar_lea.hbm %s2987_s17, 4096 }
  0xaa   :  { %p2089_p8 = scmp.ne.s32.totalorder %s2987_s17, %s2088_s22  ;;  %p2092_p9 = scmp.lt.u32.totalorder %s2088_s22, %s2987_s17 }
  0xac   :  { %p2094_p10 = pnand %p2092_p9, %p2089_p8 }
  0xae   :  { %2097 = shalt.err (!%p2094_p10)
}
  0xaf   :  { %s2098_s15 = scalar_lea.vmem %s222_s29, 4096  ;;  %p2103_p12 = scmp.lt.s32.totalorder %s222_s29, %s222_s29 }
  0xb0   :  { %p2099_p11 = scmp.ne.s32.totalorder %s222_s29, %s2098_s15  ;;  %p2104_p13 = scmp.lt.s32.totalorder %s2098_s15, %s2098_s15 }
  0xb2   :  { %p2105_p0 = por %p2104_p13, %p2103_p12 }
  0xb4   :  { %p2106_p1 = pnand %p2105_p0, %p2099_p11 }
  0xb6   :  { %2109 = shalt.err (!%p2106_p1)
}
  0xb7   :  { %227 = dma.hbm_to_vmem [thread:$0]  %s2987_s17, 4096, %s222_s29, [#allocation30], %s2423_s27, %s2423_s27, %s2424_s3  }
  0xb8   :  { %s2110_s1 = scalar_lea.hbm %s2989_s19, 16 }
  0xb9   :  { %p2111_p2 = scmp.ne.s32.totalorder %s2989_s19, %s2110_s1  ;;  %p2114_p3 = scmp.lt.u32.totalorder %s2110_s1, %s2989_s19 }
  0xbb   :  { %p2116_p4 = pnand %p2114_p3, %p2111_p2 }
  0xbd   :  { %2119 = shalt.err (!%p2116_p4)
}
  0xbe   :  { %s2120_s20 = scalar_lea.vmem %s245_s21, 16  ;;  %s2124_s23 = scalar_lea.vmem %s245_s21, 32 }
  0xbf   :  { %p2121_p5 = scmp.ne.s32.totalorder %s245_s21, %s2120_s20  ;;  %p2125_p6 = scmp.lt.s32.totalorder %s245_s21, %s245_s21 }
  0xc0   :  { %p2126_p7 = scmp.lt.s32.totalorder %s2124_s23, %s2120_s20 }
  0xc2   :  { %p2127_p8 = por %p2126_p7, %p2125_p6 }
  0xc4   :  { %p2128_p9 = pnand %p2127_p8, %p2121_p5 }
  0xc6   :  { %2131 = shalt.err (!%p2128_p9)
}
  0xc7   :  { %247 = dma.hbm_to_vmem [thread:$0]  %s2989_s19, 16, %s245_s21, [#allocation33]  }
  0xc8   :  { %s2434_s3 = smov [#allocation2]   ;;  %s2435_s11 = smov [#allocation7]  }
  0xc9   :  { %s44_s29 = sshll.u32 %s2434_s3, 4  ;;  %s64_s22 = sshll.u32 %s2435_s11, 4  ;;  %s45_s29 = int_to_ptr.vmem [resolvable:$true] %s44_s29  ;;  %s65_s22 = int_to_ptr.vmem [resolvable:$true] %s64_s22 }
  0xca   :  { %s3011_s28 = sld [smem:[#allocation48_spill]] }
  0xd0   :  { %s2132_s4 = scalar_lea.hbm %s3011_s28, 128 }
  0xd1   :  { %p2133_p10 = scmp.ne.s32.totalorder %s3011_s28, %s2132_s4  ;;  %p2136_p11 = scmp.lt.u32.totalorder %s2132_s4, %s3011_s28 }
  0xd3   :  { %p2138_p12 = pnand %p2136_p11, %p2133_p10 }
  0xd5   :  { %2141 = shalt.err (!%p2138_p12)
}
  0xd6   :  { %s2142_s19 = scalar_lea.vmem %s45_s29, 128  ;;  %p2147_p0 = scmp.lt.s32.totalorder %s45_s29, %s45_s29 }
  0xd7   :  { %p2143_p13 = scmp.ne.s32.totalorder %s45_s29, %s2142_s19  ;;  %p2148_p1 = scmp.lt.s32.totalorder %s2142_s19, %s2142_s19 }
  0xd9   :  { %p2149_p2 = por %p2148_p1, %p2147_p0 }
  0xdb   :  { %p2150_p3 = pnand %p2149_p2, %p2143_p13 }
  0xdd   :  { %2153 = shalt.err (!%p2150_p3)
}
  0xde   :  { %47 = dma.hbm_to_vmem [thread:$0]  %s3011_s28, 128, %s45_s29, [#allocation3]  }
  0xdf   :  { %s3012_s13 = sld [smem:[#allocation50_spill]] }
  0xe5   :  { %s2154_s7 = scalar_lea.hbm %s3012_s13, 128 }
  0xe6   :  { %p2155_p4 = scmp.ne.s32.totalorder %s3012_s13, %s2154_s7  ;;  %p2158_p5 = scmp.lt.u32.totalorder %s2154_s7, %s3012_s13 }
  0xe8   :  { %p2160_p6 = pnand %p2158_p5, %p2155_p4 }
  0xea   :  { %2163 = shalt.err (!%p2160_p6)
}
  0xeb   :  { %s2164_s27 = scalar_lea.vmem %s65_s22, 128  ;;  %p2169_p8 = scmp.lt.s32.totalorder %s65_s22, %s65_s22 }
  0xec   :  { %p2165_p7 = scmp.ne.s32.totalorder %s65_s22, %s2164_s27  ;;  %p2170_p9 = scmp.lt.s32.totalorder %s2164_s27, %s2164_s27 }
  0xee   :  { %p2171_p10 = por %p2170_p9, %p2169_p8 }
  0xf0   :  { %p2172_p11 = pnand %p2171_p10, %p2165_p7 }
  0xf2   :  { %2175 = shalt.err (!%p2172_p11)
}
  0xf3   :  { %67 = dma.hbm_to_vmem [thread:$0]  %s3012_s13, 128, %s65_s22, [#allocation6]  }
  0xf4   :  { %s2436_s11 = smov [#allocation10]   ;;  %s2437_s9 = smov [#allocation13]  }
  0xf5   :  { %s84_s2 = sshll.u32 %s2436_s11, 4  ;;  %s106_s28 = sshll.u32 %s2437_s9, 4  ;;  %s85_s2 = int_to_ptr.vmem [resolvable:$true] %s84_s2  ;;  %s107_s28 = int_to_ptr.vmem [resolvable:$true] %s106_s28 }
  0xf6   :  { %s3013_s5 = sld [smem:[#allocation52_spill]] }
  0xfc   :  { %s2176_s30 = scalar_lea.hbm %s3013_s5, 128 }
  0xfd   :  { %p2177_p12 = scmp.ne.s32.totalorder %s3013_s5, %s2176_s30  ;;  %p2180_p13 = scmp.lt.u32.totalorder %s2176_s30, %s3013_s5 }
  0xff   :  { %p2182_p0 = pnand %p2180_p13, %p2177_p12 }
 0x101   :  { %2185 = shalt.err (!%p2182_p0)
}
 0x102   :  { %s2186_s22 = scalar_lea.vmem %s85_s2, 128  ;;  %p2191_p2 = scmp.lt.s32.totalorder %s85_s2, %s85_s2 }
 0x103   :  { %p2187_p1 = scmp.ne.s32.totalorder %s85_s2, %s2186_s22  ;;  %p2192_p3 = scmp.lt.s32.totalorder %s2186_s22, %s2186_s22 }
 0x105   :  { %p2193_p4 = por %p2192_p3, %p2191_p2 }
 0x107   :  { %p2194_p5 = pnand %p2193_p4, %p2187_p1 }
 0x109   :  { %2197 = shalt.err (!%p2194_p5)
}
 0x10a   :  { %87 = dma.hbm_to_vmem [thread:$0]  %s3013_s5, 128, %s85_s2, [#allocation9]  }
 0x10b   :  { %s2198_s25 = scalar_lea.hbm %s2976_s6, 16 }
 0x10c   :  { %p2199_p6 = scmp.ne.s32.totalorder %s2976_s6, %s2198_s25  ;;  %p2202_p7 = scmp.lt.u32.totalorder %s2198_s25, %s2976_s6 }
 0x10e   :  { %p2204_p8 = pnand %p2202_p7, %p2199_p6 }
 0x110   :  { %2207 = shalt.err (!%p2204_p8)
}
 0x111   :  { %s2208_s3 = scalar_lea.vmem %s107_s28, 16  ;;  %s2212_s29 = scalar_lea.vmem %s107_s28, 32 }
 0x112   :  { %p2209_p9 = scmp.ne.s32.totalorder %s107_s28, %s2208_s3  ;;  %p2213_p10 = scmp.lt.s32.totalorder %s107_s28, %s107_s28 }
 0x113   :  { %p2214_p11 = scmp.lt.s32.totalorder %s2212_s29, %s2208_s3 }
 0x115   :  { %p2215_p12 = por %p2214_p11, %p2213_p10 }
 0x117   :  { %p2216_p13 = pnand %p2215_p12, %p2209_p9 }
 0x119   :  { %2219 = shalt.err (!%p2216_p13)
}
 0x11a   :  { %109 = dma.hbm_to_vmem [thread:$0]  %s2976_s6, 16, %s107_s28, [#allocation12]  }
 0x11b   :  { %s2438_s9 = smov [#allocation16]   ;;  %s2439_s15 = smov [#allocation19]  }
 0x11c   :  { %s128_s4 = sshll.u32 %s2438_s9, 4  ;;  %s148_s5 = sshll.u32 %s2439_s15, 4  ;;  %s129_s4 = int_to_ptr.vmem [resolvable:$true] %s128_s4  ;;  %s149_s5 = int_to_ptr.vmem [resolvable:$true] %s148_s5 }
 0x11d   :  { %s2220_s19 = scalar_lea.hbm %s2978_s8, 256 }
 0x11e   :  { %p2221_p0 = scmp.ne.s32.totalorder %s2978_s8, %s2220_s19  ;;  %p2224_p1 = scmp.lt.u32.totalorder %s2220_s19, %s2978_s8 }
 0x120   :  { %p2226_p2 = pnand %p2224_p1, %p2221_p0 }
 0x122   :  { %2229 = shalt.err (!%p2226_p2)
}
 0x123   :  { %s2230_s6 = scalar_lea.vmem %s129_s4, 256  ;;  %p2235_p4 = scmp.lt.s32.totalorder %s129_s4, %s129_s4 }
 0x124   :  { %p2231_p3 = scmp.ne.s32.totalorder %s129_s4, %s2230_s6  ;;  %p2236_p5 = scmp.lt.s32.totalorder %s2230_s6, %s2230_s6 }
 0x126   :  { %p2237_p6 = por %p2236_p5, %p2235_p4 }
 0x128   :  { %p2238_p7 = pnand %p2237_p6, %p2231_p3 }
 0x12a   :  { %2241 = shalt.err (!%p2238_p7)
}
 0x12b   :  { %131 = dma.hbm_to_vmem [thread:$0]  %s2978_s8, 256, %s129_s4, [#allocation15]  }
 0x12c   :  { %s2242_s25 = scalar_lea.hbm %s2980_s10, 32 }
 0x12d   :  { %p2243_p8 = scmp.ne.s32.totalorder %s2980_s10, %s2242_s25  ;;  %p2246_p9 = scmp.lt.u32.totalorder %s2242_s25, %s2980_s10 }
 0x12f   :  { %p2248_p10 = pnand %p2246_p9, %p2243_p8 }
 0x131   :  { %2251 = shalt.err (!%p2248_p10)
}
 0x132   :  { %s2252_s3 = scalar_lea.vmem %s149_s5, 32  ;;  %p2257_p12 = scmp.lt.s32.totalorder %s149_s5, %s149_s5 }
 0x133   :  { %p2253_p11 = scmp.ne.s32.totalorder %s149_s5, %s2252_s3  ;;  %p2258_p13 = scmp.lt.s32.totalorder %s2252_s3, %s2252_s3 }
 0x135   :  { %p2259_p0 = por %p2258_p13, %p2257_p12 }
 0x137   :  { %p2260_p1 = pnand %p2259_p0, %p2253_p11 }
 0x139   :  { %2263 = shalt.err (!%p2260_p1)
}
 0x13a   :  { %151 = dma.hbm_to_vmem [thread:$0]  %s2980_s10, 32, %s149_s5, [#allocation18]  }
 0x13b   :  { %s2440_s11 = smov [#allocation22]   ;;  %s2441_s9 = smov [#allocation25]  }
 0x13c   :  { %s170_s2 = sshll.u32 %s2440_s11, 4  ;;  %s192_s4 = sshll.u32 %s2441_s9, 4  ;;  %s171_s2 = int_to_ptr.vmem [resolvable:$true] %s170_s2  ;;  %s193_s4 = int_to_ptr.vmem [resolvable:$true] %s192_s4 }
 0x13d   :  { %s2264_s0 = scalar_lea.hbm %s2982_s12, 32 }
 0x13e   :  { %p2265_p2 = scmp.ne.s32.totalorder %s2982_s12, %s2264_s0  ;;  %p2268_p3 = scmp.lt.u32.totalorder %s2264_s0, %s2982_s12 }
 0x140   :  { %p2270_p4 = pnand %p2268_p3, %p2265_p2 }
 0x142   :  { %2273 = shalt.err (!%p2270_p4)
}
 0x143   :  { %s2274_s10 = scalar_lea.vmem %s171_s2, 32  ;;  %p2279_p6 = scmp.lt.s32.totalorder %s171_s2, %s171_s2 }
 0x144   :  { %p2275_p5 = scmp.ne.s32.totalorder %s171_s2, %s2274_s10  ;;  %p2280_p7 = scmp.lt.s32.totalorder %s2274_s10, %s2274_s10 }
 0x146   :  { %p2281_p8 = por %p2280_p7, %p2279_p6 }
 0x148   :  { %p2282_p9 = pnand %p2281_p8, %p2275_p5 }
 0x14a   :  { %2285 = shalt.err (!%p2282_p9)
}
 0x14b   :  { %173 = dma.hbm_to_vmem [thread:$0]  %s2982_s12, 32, %s171_s2, [#allocation21]  }
 0x14c   :  { %s2286_s26 = scalar_lea.hbm %s2984_s14, 256 }
 0x14d   :  { %p2287_p10 = scmp.ne.s32.totalorder %s2984_s14, %s2286_s26  ;;  %p2290_p11 = scmp.lt.u32.totalorder %s2286_s26, %s2984_s14 }
 0x14f   :  { %p2292_p12 = pnand %p2290_p11, %p2287_p10 }
 0x151   :  { %2295 = shalt.err (!%p2292_p12)
}
 0x152   :  { %s2296_s23 = scalar_lea.vmem %s193_s4, 256  ;;  %p2301_p0 = scmp.lt.s32.totalorder %s193_s4, %s193_s4 }
 0x153   :  { %p2297_p13 = scmp.ne.s32.totalorder %s193_s4, %s2296_s23  ;;  %p2302_p1 = scmp.lt.s32.totalorder %s2296_s23, %s2296_s23 }
 0x155   :  { %p2303_p2 = por %p2302_p1, %p2301_p0 }
 0x157   :  { %p2304_p3 = pnand %p2303_p2, %p2297_p13 }
 0x159   :  { %2307 = shalt.err (!%p2304_p3)
}
 0x15a   :  { %195 = dma.hbm_to_vmem [thread:$0]  %s2984_s14, 256, %s193_s4, [#allocation24]  }
 0x15b   :  { %s2442_s27 = smov [#allocation28]   ;;  %s2443_s8 = smov [#allocation31]  }
 0x15c   :  { %s212_s3 = sshll.u32 %s2442_s27, 4  ;;  %s234_s29 = sshll.u32 %s2443_s8, 4  ;;  %s213_s3 = int_to_ptr.vmem [resolvable:$true] %s212_s3  ;;  %s235_s29 = int_to_ptr.vmem [resolvable:$true] %s234_s29 }
 0x15d   :  { %s2308_s9 = scalar_lea.hbm %s2986_s16, 32 }
 0x15e   :  { %p2309_p4 = scmp.ne.s32.totalorder %s2986_s16, %s2308_s9  ;;  %p2312_p5 = scmp.lt.u32.totalorder %s2308_s9, %s2986_s16 }
 0x160   :  { %p2314_p6 = pnand %p2312_p5, %p2309_p4 }
 0x162   :  { %2317 = shalt.err (!%p2314_p6)
}
 0x163   :  { %s2318_s14 = scalar_lea.vmem %s213_s3, 32  ;;  %p2323_p8 = scmp.lt.s32.totalorder %s213_s3, %s213_s3 }
 0x164   :  { %p2319_p7 = scmp.ne.s32.totalorder %s213_s3, %s2318_s14  ;;  %p2324_p9 = scmp.lt.s32.totalorder %s2318_s14, %s2318_s14 }
 0x166   :  { %p2325_p10 = por %p2324_p9, %p2323_p8 }
 0x168   :  { %p2326_p11 = pnand %p2325_p10, %p2319_p7 }
 0x16a   :  { %2329 = shalt.err (!%p2326_p11)
}
 0x16b   :  { %215 = dma.hbm_to_vmem [thread:$0]  %s2986_s16, 32, %s213_s3, [#allocation27]  }
 0x16c   :  { %s2330_s10 = scalar_lea.hbm %s2988_s18, 16 }
 0x16d   :  { %p2331_p12 = scmp.ne.s32.totalorder %s2988_s18, %s2330_s10  ;;  %p2334_p13 = scmp.lt.u32.totalorder %s2330_s10, %s2988_s18 }
 0x16f   :  { %p2336_p0 = pnand %p2334_p13, %p2331_p12 }
 0x171   :  { %2339 = shalt.err (!%p2336_p0)
}
 0x172   :  { %s2340_s26 = scalar_lea.vmem %s235_s29, 16  ;;  %s2344_s13 = scalar_lea.vmem %s235_s29, 32 }
 0x173   :  { %p2341_p1 = scmp.ne.s32.totalorder %s235_s29, %s2340_s26  ;;  %p2345_p2 = scmp.lt.s32.totalorder %s235_s29, %s235_s29 }
 0x174   :  { %p2346_p3 = scmp.lt.s32.totalorder %s2344_s13, %s2340_s26 }
 0x176   :  { %p2347_p4 = por %p2346_p3, %p2345_p2 }
 0x178   :  { %p2348_p5 = pnand %p2347_p4, %p2341_p1 }
 0x17a   :  { %2351 = shalt.err (!%p2348_p5)
}
 0x17b   :  { %237 = dma.hbm_to_vmem [thread:$0]  %s2988_s18, 16, %s235_s29, [#allocation30]  }
 0x17c   :  { %s2444_s25 = smov [#allocation34]   ;;  %s3014_s17 = sld [smem:[#allocation54_spill]] }
 0x17d   :  { %s254_s20 = sshll.u32 %s2444_s25, 4  ;;  %s255_s20 = int_to_ptr.vmem [resolvable:$true] %s254_s20 }
 0x182   :  { %s2352_s27 = scalar_lea.hbm %s3014_s17, 16 }
 0x183   :  { %p2353_p6 = scmp.ne.s32.totalorder %s3014_s17, %s2352_s27  ;;  %p2356_p7 = scmp.lt.u32.totalorder %s2352_s27, %s3014_s17 }
 0x185   :  { %p2358_p8 = pnand %p2356_p7, %p2353_p6 }
 0x187   :  { %2361 = shalt.err (!%p2358_p8)
}
 0x188   :  { %s2362_s9 = scalar_lea.vmem %s255_s20, 16  ;;  %s2366_s18 = scalar_lea.vmem %s255_s20, 32 }
 0x189   :  { %p2363_p9 = scmp.ne.s32.totalorder %s255_s20, %s2362_s9  ;;  %p2367_p10 = scmp.lt.s32.totalorder %s255_s20, %s255_s20 }
 0x18a   :  { %p2368_p11 = scmp.lt.s32.totalorder %s2366_s18, %s2362_s9 }
 0x18c   :  { %p2369_p12 = por %p2368_p11, %p2367_p10 }
 0x18e   :  { %p2370_p13 = pnand %p2369_p12, %p2363_p9 }
 0x190   :  { %2373 = shalt.err (!%p2370_p13)
}
 0x191   :  { %257 = dma.hbm_to_vmem [thread:$0]  %s3014_s17, 16, %s255_s20, [#allocation33]  }
 0x192   :  { %2396 = dma.done.wait [#allocation3], 128  }
 0x193   :  { %2397 = vsyncadd [#allocation3], 4294967168 }
 0x194   :  { %2398 = dma.done.wait [#allocation6], 256  }
 0x195   :  { %2399 = vsyncadd [#allocation6], 4294967040 }
 0x196   :  { %2400 = dma.done.wait [#allocation9], 256  }
 0x197   :  { %2401 = vsyncadd [#allocation9], 4294967040 }
 0x198   :  { %2402 = dma.done.wait [#allocation12], 272  }
 0x199   :  { %2403 = vsyncadd [#allocation12], 4294967024 }
 0x19a   :  { %2404 = dma.done.wait [#allocation15], 2816  }
 0x19b   :  { %2405 = vsyncadd [#allocation15], 4294964480 }
 0x19c   :  { %2406 = dma.done.wait [#allocation18], 64  }
 0x19d   :  { %2407 = vsyncadd [#allocation18], 4294967232 }
 0x19e   :  { %2408 = dma.done.wait [#allocation21], 5152  }
 0x19f   :  { %2409 = vsyncadd [#allocation21], 4294962144 }
 0x1a0   :  { %2410 = dma.done.wait [#allocation24], 4352  }
 0x1a1   :  { %2411 = vsyncadd [#allocation24], 4294962944 }
 0x1a2   :  { %2412 = dma.done.wait [#allocation27], 64  }
 0x1a3   :  { %2413 = vsyncadd [#allocation27], 4294967232 }
 0x1a4   :  { %2414 = dma.done.wait [#allocation30], 4112  }
 0x1a5   :  { %2415 = vsyncadd [#allocation30], 4294963184 }
 0x1a6   :  { %2416 = dma.done.wait [#allocation33], 32  }
 0x1a7   :  { %2417 = vsyncadd [#allocation33], 4294967264  ;;  %v2445_v0 = vmov 0.0|0.0   ;;  %vm2446_vm0 = vmmov 0   ;;  %v2447_v1 = vmov 0.0   ;;  %v322_v2 = vld [vmem:[#allocation11] sm:$0xff] }
 0x1a8   :  { %1675 = vmatprep.subr.bf16.mxu0 %v2445_v0  ;;  %1672 = vmatprep.mubr.msk.f32.mxu0 %vm2446_vm0, %v2447_v1  ;;  %v323_v3 = vld [vmem:[#allocation11 + $0x8] sm:$0xff]  ;;  %v406_v5 = vld [vmem:[#allocation5] sm:$0xff]  ;;  %v408_v6 = vld [vmem:[#allocation8] sm:$0xff]  ;;  %s2448_s30 = smov 32   ;;  %s2449_s0 = smov 96   ;;  %vm331_vm1 = vcmask 130048  }
 0x1a9   :  { %1678 = vmatprep.subr.bf16.mxu1 %v2445_v0  ;;  %v1676_v4 = vpack.c.bf16 %v323_v3, %v322_v2  ;;  %410 = vrot.lane.b32.xlu0 %v406_v5, %s2448_s30  ;;  %v455_v7 = vld [vmem:[#allocation14] sm:$0xff]  ;;  %v456_v8 = vld [vmem:[#allocation14 + $0x8] sm:$0xff]  ;;  %v457_v9 = vld [vmem:[#allocation14 + $0x10] sm:$0xff]  ;;  %s2450_s19 = smov 64   ;;  %vm421_vm2 = vcmask 261120   ;;  %vm423_vm3 = vcmask 523264  }
 0x1aa   :  { %418 = vrot.lane.b32.xlu1 %v408_v6, %s2449_s0  ;;  %v321_v10 = vld [vmem:[#allocation10] sm:$0xff]  ;;  %v407_v11 = vld [vmem:[#allocation7] sm:$0xff]  ;;  %v1679_v12 = vpack.c.bf16 %v456_v8, %v455_v7  ;;  %vm425_vm4 = vcmask 785408   ;;  %v1544_v49 = vld [vmem:[#allocation13] ss:$0 sm:$0xff]  ;;  %vm635_vm5 = vcmask 1044480  }
 0x1ab   :  { %1677 = vmatpush3.bf16.msra.mxu0 %v1676_v4  ;;  %v458_v13 = vld [vmem:[#allocation14 + $0x18] sm:$0xff]  ;;  %v459_v15 = vld [vmem:[#allocation14 + $0x20] sm:$0xff]  ;;  %v460_v16 = vld [vmem:[#allocation14 + $0x28] sm:$0xff]  ;;  %vm631_vm6 = vcmask 39936   ;;  %vm1168_vm7 = vcmask 64512   ;;  %s2451_s14 = smov [#allocation35]  }
 0x1ac   :  { %1708 = vmatprep.subr.bf16.mxu0 %v2445_v0  ;;  %1680 = vmatpush1.bf16.msra.mxu1 %v1679_v12  ;;  %v1682_v14 = vpack.c.bf16 %v458_v13, %v457_v9  ;;  %v1685_v17 = vpack.c.bf16 %v460_v16, %v459_v15  ;;  %v461_v18 = vld [vmem:[#allocation14 + $0x30] sm:$0xff]  ;;  %v462_v19 = vld [vmem:[#allocation14 + $0x38] sm:$0xff]  ;;  %v463_v21 = vld [vmem:[#allocation14 + $0x40] sm:$0xff]  ;;  %s1525_s4 = sshll.u32 %s2451_s14, 4  ;;  %s1526_s4 = int_to_ptr.vmem [resolvable:$true] %s1525_s4 }
 0x1ad   :  { %414 = vrot.lane.b32.xlu0 %v407_v11, %s2450_s19  ;;  %1681 = vmatprep.subr.bf16.mxu1 %v2445_v0  ;;  %v1688_v20 = vpack.c.bf16 %v462_v19, %v461_v18  ;;  %v464_v22 = vld [vmem:[#allocation14 + $0x48] sm:$0xff]  ;;  %v465_v24 = vld [vmem:[#allocation14 + $0x50] sm:$0xff]  ;;  %v466_v25 = vld [vmem:[#allocation14 + $0x58] sm:$0xff]  ;;  %s2374_s21 = scalar_lea.vmem %s1526_s4, 128  ;;  %p2379_p1 = scmp.lt.s32.totalorder %s1526_s4, %s1526_s4 }
 0x1ae   :  { %1673 = vmatmul.mubr.msk.f32.vlgmr.msra.gmra.mrb[0].mxu0 %vm331_vm1, %v321_v10  ;;  %v1691_v23 = vpack.c.bf16 %v464_v22, %v463_v21  ;;  %v1694_v26 = vpack.c.bf16 %v466_v25, %v465_v24  ;;  %v467_v27 = vld [vmem:[#allocation14 + $0x60] sm:$0xff]  ;;  %v468_v28 = vld [vmem:[#allocation14 + $0x68] sm:$0xff]  ;;  %v469_v30 = vld [vmem:[#allocation14 + $0x70] sm:$0xff]  ;;  %p2375_p0 = scmp.ne.s32.totalorder %s1526_s4, %s2374_s21  ;;  %p2380_p2 = scmp.lt.s32.totalorder %s2374_s21, %s2374_s21 }
 0x1af   :  { %1710 = vmatpush1.bf16.msra.mxu0 %v1679_v12  ;;  %v1697_v29 = vpack.c.bf16 %v468_v28, %v467_v27  ;;  %v470_v31 = vld [vmem:[#allocation14 + $0x78] sm:$0xff]  ;;  %v471_v33 = vld [vmem:[#allocation14 + $0x80] sm:$0xff]  ;;  %v472_v34 = vld [vmem:[#allocation14 + $0x88] sm:$0xff] }
 0x1b0   :  { %1711 = vmatprep.subr.bf16.mxu0 %v2445_v0  ;;  %1683 = vmatpush1.bf16.msra.mxu1 %v1682_v14  ;;  %v1700_v32 = vpack.c.bf16 %v470_v31, %v469_v30  ;;  %v1703_v35 = vpack.c.bf16 %v472_v34, %v471_v33  ;;  %v473_v36 = vld [vmem:[#allocation14 + $0x90] sm:$0xff]  ;;  %v474_v37 = vld [vmem:[#allocation14 + $0x98] sm:$0xff]  ;;  %v405_v40 = vld [vmem:[#allocation2] sm:$0xff]  ;;  %p2381_p3 = por %p2380_p2, %p2379_p1 }
 0x1b1   :  { %1684 = vmatprep.subr.bf16.mxu1 %v2445_v0  ;;  %v1706_v38 = vpack.c.bf16 %v474_v37, %v473_v36  ;;  %v630_v15 = vld [vmem:[#allocation16 + $0x8] sm:$0x1f]  ;;  %v629_v16 = vld [vmem:[#allocation16] sm:$0x1f]  ;;  %v835_v19 = vld [vmem:[#allocation20] sm:$0xff] }
 0x1b2   :  { %v838_v18 = vld [vmem:[#allocation20 + $0x18] sm:$0xff]  ;;  %v837_v21 = vld [vmem:[#allocation20 + $0x10] sm:$0xff]  ;;  %v840_v22 = vld [vmem:[#allocation20 + $0x28] sm:$0xff]  ;;  %p2382_p4 = pnand %p2381_p3, %p2375_p0 }
 0x1b3   :  { %1713 = vmatpush1.bf16.msra.mxu0 %v1682_v14  ;;  %v1740_v24 = vpack.c.bf16 %v837_v21, %v835_v19  ;;  %v841_v27 = vld [vmem:[#allocation20 + $0x30] sm:$0xff]  ;;  %v844_v28 = vld [vmem:[#allocation20 + $0x48] sm:$0xff] }
 0x1b4   :  { %1714 = vmatprep.subr.bf16.mxu0 %v2445_v0  ;;  %1686 = vmatpush1.bf16.msra.mxu1 %v1685_v17  ;;  %v845_v33 = vld [vmem:[#allocation20 + $0x50] sm:$0xff]  ;;  %v872_v21 = vld [vmem:[#allocation20 + $0x128] sm:$0xff] }
 0x1b5   :  { %1687 = vmatprep.subr.bf16.mxu1 %v2445_v0  ;;  %v869_v19 = vld [vmem:[#allocation20 + $0x110] sm:$0xff] }
 0x1b7   :  { %1716 = vmatpush1.bf16.msra.mxu0 %v1685_v17  ;;  %v836_v17 = vld [vmem:[#allocation20 + $0x8] sm:$0xff] }
 0x1b8   :  { %1717 = vmatprep.subr.bf16.mxu0 %v2445_v0  ;;  %1689 = vmatpush1.bf16.msra.mxu1 %v1688_v20 }
 0x1b9   :  { %1690 = vmatprep.subr.bf16.mxu1 %v2445_v0 }
 0x1bb   :  { %1719 = vmatpush1.bf16.msra.mxu0 %v1688_v20  ;;  %v1738_v20 = vpack.c.bf16 %v838_v18, %v836_v17  ;;  %v867_v18 = vld [vmem:[#allocation20 + $0x100] sm:$0xff] }
 0x1bc   :  { %1720 = vmatprep.subr.bf16.mxu0 %v2445_v0  ;;  %1692 = vmatpush1.bf16.msra.mxu1 %v1691_v23 }
 0x1bd   :  { %1693 = vmatprep.subr.bf16.mxu1 %v2445_v0 }
 0x1bf   :  { %1722 = vmatpush1.bf16.msra.mxu0 %v1691_v23  ;;  %v842_v23 = vld [vmem:[#allocation20 + $0x38] sm:$0xff] }
 0x1c0   :  { %1723 = vmatprep.subr.bf16.mxu0 %v2445_v0  ;;  %1695 = vmatpush1.bf16.msra.mxu1 %v1694_v26  ;;  %v1742_v25 = vpack.c.bf16 %v842_v23, %v840_v22  ;;  %v874_v22 = vld [vmem:[#allocation20 + $0x138] sm:$0xff] }
 0x1c1   :  { %1696 = vmatprep.subr.bf16.mxu1 %v2445_v0  ;;  %v1774_v23 = vpack.c.bf16 %v874_v22, %v872_v21  ;;  %v1014_v21 = vld [vmem:[#allocation23 + $0xd8] sm:$0xff] }
 0x1c3   :  { %1725 = vmatpush1.bf16.msra.mxu0 %v1694_v26  ;;  %v839_v26 = vld [vmem:[#allocation20 + $0x20] sm:$0xff] }
 0x1c4   :  { %1726 = vmatprep.subr.bf16.mxu0 %v2445_v0  ;;  %1698 = vmatpush1.bf16.msra.mxu1 %v1697_v29  ;;  %v1744_v30 = vpack.c.bf16 %v841_v27, %v839_v26  ;;  %v1003_v27 = vld [vmem:[#allocation23 + $0x80] sm:$0xff] }
 0x1c5   :  { %1699 = vmatprep.subr.bf16.mxu1 %v2445_v0 }
 0x1c7   :  { %1728 = vmatpush1.bf16.msra.mxu0 %v1697_v29  ;;  %v846_v29 = vld [vmem:[#allocation20 + $0x58] sm:$0xff] }
 0x1c8   :  { %1729 = vmatprep.subr.bf16.mxu0 %v2445_v0  ;;  %1701 = vmatpush1.bf16.msra.mxu1 %v1700_v32  ;;  %v1746_v31 = vpack.c.bf16 %v846_v29, %v844_v28  ;;  %v1004_v28 = vld [vmem:[#allocation23 + $0x88] sm:$0xff]  ;;  %v987_v29 = vld [vmem:[#allocation23] sm:$0xff] }
 0x1c9   :  { %1702 = vmatprep.subr.bf16.mxu1 %v2445_v0 }
 0x1cb   :  { %1731 = vmatpush1.bf16.msra.mxu0 %v1700_v32  ;;  %v843_v32 = vld [vmem:[#allocation20 + $0x40] sm:$0xff] }
 0x1cc   :  { %1732 = vmatprep.subr.bf16.mxu0 %v2445_v0  ;;  %1704 = vmatpush1.bf16.msra.mxu1 %v1703_v35  ;;  %v1748_v34 = vpack.c.bf16 %v845_v33, %v843_v32  ;;  %v1005_v32 = vld [vmem:[#allocation23 + $0x90] sm:$0xff]  ;;  %v1006_v33 = vld [vmem:[#allocation23 + $0x98] sm:$0xff] }
 0x1cd   :  { %1705 = vmatprep.subr.bf16.mxu1 %v2445_v0 }
 0x1cf   :  { %1734 = vmatpush1.bf16.msra.mxu0 %v1703_v35 }
 0x1d0   :  { %1735 = vmatprep.subr.bf16.mxu0 %v2445_v0  ;;  %1707 = vmatpush1.bf16.msra.mxu1 %v1706_v38 }
 0x1d1   :  { %1739 = vmatprep.subr.bf16.mxu1 %v1738_v20  ;;  %v1772_v20 = vpack.c.bf16 %v869_v19, %v867_v18  ;;  %v996_v18 = vld [vmem:[#allocation23 + $0x48] sm:$0xff] }
 0x1d3   :  { %1737 = vmatpush1.bf16.msra.mxu0 %v1706_v38 }
 0x1d4   :  { %1548 = vmatprep.subr.msk.mxu0 %vm635_vm5, %v630_v15 }
 0x21b   :  { %v411_v39 = vpop.permute.xlu0 %410 }
 0x21c   :  { %v422_v41 = vsel %vm421_vm2, %v405_v40, %v411_v39  ;;  %v419_v44 = vpop.permute.xlu1 %418 }
 0x21f   :  { %v415_v42 = vpop.permute.xlu0 %414 }
 0x220   :  { %v424_v43 = vsel %vm423_vm3, %v422_v41, %v415_v42 }
 0x221   :  { %v2849_v45 = vsel %vm425_vm4, %v424_v43, %v419_v44 }
 0x222   :  { %v440_v46 = vmul.f32 %v2849_v45, %v2849_v45  ;;  %v427_v47 = vrot.slane %v2849_v45, 4 }
 0x224   :  { %v442_v48 = vrot.slane %v440_v46, 4  ;;  %v428_v50 = vadd.f32 %v427_v47, %v2849_v45  ;;  %v848_v47 = vld [vmem:[#allocation20 + $0x68] sm:$0xff] }
 0x226   :  { %v443_v52 = vadd.f32 %v442_v48, %v440_v46  ;;  %v429_v55 = vrot.slane %v428_v50, 2  ;;  %v850_v48 = vld [vmem:[#allocation20 + $0x78] sm:$0xff] }
 0x228   :  { %v444_v59 = vrot.slane %v443_v52, 2  ;;  %v430_v63 = vadd.f32 %v429_v55, %v428_v50  ;;  %v847_v50 = vld [vmem:[#allocation20 + $0x60] sm:$0xff]  ;;  %v854_v55 = vld [vmem:[#allocation20 + $0x98] sm:$0xff] }
 0x22a   :  { %v445_v3 = vadd.f32 %v444_v59, %v443_v52  ;;  %v431_v6 = vrot.slane %v430_v63, 1  ;;  %v856_v59 = vld [vmem:[#allocation20 + $0xa8] sm:$0xff] }
 0x22c   :  { %v446_v9 = vrot.slane %v445_v3, 1  ;;  %v432_v12 = vadd.f32 %v431_v6, %v430_v63  ;;  %v857_v63 = vld [vmem:[#allocation20 + $0xb0] sm:$0xff]  ;;  %v859_v6 = vld [vmem:[#allocation20 + $0xc0] sm:$0xff] }
 0x22e   :  { %v447_v14 = vadd.f32 %v446_v9, %v445_v3  ;;  %v862_v3 = vld [vmem:[#allocation20 + $0xd8] sm:$0xff] }
 0x22f   :  { %v866_v9 = vld [vmem:[#allocation20 + $0xf8] sm:$0xff] }
 0x281   :  { %v401_v51 = vpop.f32.mrb[0].mxu0 }
 0x282   :  { %v2855_v53 = vadd.f32 %v1544_v49, %v401_v51  ;;  %v1674_v54 = vpop.f32.mrb[1].mxu0  ;;  %v1750_v49 = vpack.c.bf16 %v850_v48, %v848_v47  ;;  %v849_v51 = vld [vmem:[#allocation20 + $0x70] sm:$0xff] }
 0x283   :  { %v1752_v52 = vpack.c.bf16 %v849_v51, %v847_v50  ;;  %v852_v54 = vld [vmem:[#allocation20 + $0x88] sm:$0xff]  ;;  %v994_v50 = vld [vmem:[#allocation23 + $0x38] sm:$0xff] }
 0x284   :  { %v433_v56 = vsel %vm421_vm2, %v2855_v53, 0.0  ;;  %v441_v57 = vmul.f32 %v2855_v53, %v2855_v53 }
 0x285   :  { %v434_v58 = vrot.slane %v433_v56, 4 }
 0x286   :  { %v448_v60 = vsel %vm421_vm2, %v441_v57, 0.0  ;;  %v851_v57 = vld [vmem:[#allocation20 + $0x80] sm:$0xff] }
 0x287   :  { %v449_v61 = vrot.slane %v448_v60, 4  ;;  %v435_v62 = vadd.f32 %v434_v58, %v433_v56  ;;  %v1754_v56 = vpack.c.bf16 %v854_v55, %v852_v54  ;;  %v853_v58 = vld [vmem:[#allocation20 + $0x90] sm:$0xff]  ;;  %v787_v55 = vlaneseq }
 0x289   :  { %v450_v0 = vadd.f32 %v449_v61, %v448_v60  ;;  %v436_v2 = vrot.slane %v435_v62, 2  ;;  %v1756_v60 = vpack.c.bf16 %v853_v58, %v851_v57  ;;  %v858_v61 = vld [vmem:[#allocation20 + $0xb8] sm:$0xff] }
 0x28b   :  { %v451_v4 = vrot.slane %v450_v0, 2  ;;  %v437_v5 = vadd.f32 %v436_v2, %v435_v62  ;;  %v855_v62 = vld [vmem:[#allocation20 + $0xa0] sm:$0xff]  ;;  %v860_v2 = vld [vmem:[#allocation20 + $0xc8] sm:$0xff] }
 0x28d   :  { %v438_v7 = vrot.slane %v437_v5, 1  ;;  %v452_v8 = vadd.f32 %v451_v4, %v450_v0  ;;  %v1758_v0 = vpack.c.bf16 %v858_v61, %v856_v59  ;;  %v1760_v4 = vpack.c.bf16 %v857_v63, %v855_v62 }
 0x28f   :  { %v439_v10 = vadd.f32 %v438_v7, %v437_v5  ;;  %v453_v11 = vrot.slane %v452_v8, 1  ;;  %v1762_v5 = vpack.c.bf16 %v862_v3, %v860_v2  ;;  %v861_v7 = vld [vmem:[#allocation20 + $0xd0] sm:$0xff]  ;;  %v821_v3 = vld [vmem:[#allocation19] sm:$0x3] }
 0x291   :  { %1546 = vmatprep.mubr.msk.f32.mxu1 %vm421_vm2, %v439_v10  ;;  %v454_v13 = vadd.f32 %v453_v11, %v452_v8  ;;  %v864_v8 = vld [vmem:[#allocation20 + $0xe8] sm:$0xff]  ;;  %v1764_v10 = vpack.c.bf16 %v861_v7, %v859_v6 }
 0x292   :  { %543 = vmatmul.mubr.f32.vlgmr.msra.gmra.mrb[0].mxu1 %v432_v12  ;;  %v1766_v11 = vpack.c.bf16 %v866_v9, %v864_v8  ;;  %v863_v12 = vld [vmem:[#allocation20 + $0xe0] sm:$0xff] }
 0x293   :  { %1547 = vmatprep.mubr.msk.f32.mxu0 %vm421_vm2, %v454_v13  ;;  %1741 = vmatpush1.bf16.msra.mxu1 %v1740_v24  ;;  %v865_v13 = vld [vmem:[#allocation20 + $0xf0] sm:$0xff]  ;;  %v871_v24 = vld [vmem:[#allocation20 + $0x120] sm:$0xff] }
 0x294   :  { %618 = vmatmul.mubr.f32.vlgmr.msra.gmra.mrb[2].mxu0 %v447_v14  ;;  %1743 = vmatprep.subr.bf16.mxu1 %v1742_v25  ;;  %v1768_v14 = vpack.c.bf16 %v865_v13, %v863_v12  ;;  %v873_v25 = vld [vmem:[#allocation20 + $0x130] sm:$0xff] }
 0x295   :  { %706 = vmatprep.mubr.f32.mxu0 %v2447_v1  ;;  %1549 = vmatpush1.msk.msra.mxu0 %vm635_vm5, %v629_v16  ;;  %v1776_v26 = vpack.c.bf16 %v873_v25, %v871_v24  ;;  %v998_v24 = vld [vmem:[#allocation23 + $0x58] sm:$0xff] }
 0x296   :  { %1551 = vmatprep.subr.msk.mxu0 %vm635_vm5, %v630_v15  ;;  %v868_v15 = vld [vmem:[#allocation20 + $0x108] sm:$0xff] }
 0x297   :  { %1745 = vmatpush1.bf16.msra.mxu1 %v1744_v30  ;;  %v2870_v30 = vpack.c.bf16 %v1004_v28, %v1003_v27  ;;  %v1016_v27 = vld [vmem:[#allocation23 + $0xe8] sm:$0xff] }
 0x298   :  { %1747 = vmatprep.subr.bf16.mxu1 %v1746_v31  ;;  %v988_v31 = vld [vmem:[#allocation23 + $0x8] sm:$0xff] }
 0x29b   :  { %1749 = vmatpush1.bf16.msra.mxu1 %v1748_v34  ;;  %v2872_v34 = vpack.c.bf16 %v988_v31, %v987_v29  ;;  %v999_v29 = vld [vmem:[#allocation23 + $0x60] sm:$0xff]  ;;  %v1000_v31 = vld [vmem:[#allocation23 + $0x68] sm:$0xff] }
 0x29c   :  { %1751 = vmatprep.subr.bf16.mxu1 %v1750_v49  ;;  %v993_v49 = vld [vmem:[#allocation23 + $0x30] sm:$0xff] }
 0x29d   :  { %v2890_v51 = vpack.c.bf16 %v994_v50, %v993_v49 }
 0x29f   :  { %1753 = vmatpush1.bf16.msra.mxu1 %v1752_v52 }
 0x2a0   :  { %1755 = vmatprep.subr.bf16.mxu1 %v1754_v56  ;;  %v788_v56 = vshrl.u32 %v787_v55, 7 }
 0x2a2   :  { %v2894_v57 = vsub.s32 0, %v788_v56  ;;  %v2898_v61 = vsub.s32 1, %v788_v56 }
 0x2a3   :  { %1757 = vmatpush1.bf16.msra.mxu1 %v1756_v60  ;;  %v807_v60 = vld [vmem:[#allocation17] sm:$0x3] }
 0x2a4   :  { %1759 = vmatprep.subr.bf16.mxu1 %v1758_v0  ;;  %v812_v2 = vrot.slane %v807_v60, %v2894_v57  ;;  %v816_v7 = vrot.slane %v807_v60, %v2898_v61  ;;  %v826_v12 = vrot.slane %v821_v3, %v2894_v57 }
 0x2a7   :  { %1761 = vmatpush1.bf16.msra.mxu1 %v1760_v4 }
 0x2a8   :  { %1763 = vmatprep.subr.bf16.mxu1 %v1762_v5 }
 0x2ab   :  { %1765 = vmatpush1.bf16.msra.mxu1 %v1764_v10  ;;  %v830_v10 = vrot.slane %v821_v3, %v2898_v61 }
 0x2ac   :  { %1767 = vmatprep.subr.bf16.mxu1 %v1766_v11 }
 0x2af   :  { %1769 = vmatpush1.bf16.msra.mxu1 %v1768_v14 }
 0x365   :  { %v544_v35 = vpop.f32.mrb[0].mxu1 }
 0x366   :  { %v549_v36 = vmul.f32 0.00390625, %v544_v35  ;;  %v546_v37 = vpop.f32.mrb[1].mxu1  ;;  %v2874_v35 = vpack.c.bf16 %v1006_v33, %v1005_v32  ;;  %v1804_v32 = vpack.c.bf16 %v1000_v31, %v999_v29  ;;  %v1017_v33 = vld [vmem:[#allocation23 + $0xf0] sm:$0xff]  ;;  %v1368_v29 = vld [vmem:[#allocation29 + $0x8] sm:$0xff]  ;;  %v1385_v31 = vld [vmem:[#allocation29 + $0x90] sm:$0xff] }
 0x367   :  { %v619_v38 = vpop.f32.mrb[2].mxu0  ;;  %v990_v37 = vld [vmem:[#allocation23 + $0x18] sm:$0xff] }
 0x368   :  { %v624_v39 = vmul.f32 %v549_v36, %v549_v36  ;;  %v623_v40 = vmul.f32 0.00390625, %v619_v38  ;;  %v621_v41 = vpop.f32.mrb[3].mxu0  ;;  %1550 = vmatmul.mubr.msk.f32.vlgmr.msra.gmra.mrb[4].mxu0 %vm631_vm6, %v549_v36  ;;  %v989_v36 = vld [vmem:[#allocation23 + $0x10] sm:$0xff]  ;;  %v1007_v38 = vld [vmem:[#allocation23 + $0xa0] sm:$0xff] }
 0x369   :  { %1552 = vmatpush1.msk.msra.mxu0 %vm635_vm5, %v629_v16  ;;  %780 = vmatprep.mubr.f32.mxu0 %v2447_v1  ;;  %v870_v16 = vld [vmem:[#allocation20 + $0x118] sm:$0xff] }
 0x36a   :  { %v625_v42 = vsub.f32 %v623_v40, %v624_v39  ;;  %v1770_v17 = vpack.c.bf16 %v870_v16, %v868_v15  ;;  %1779 = vmatprep.subr.bf16.mxu0 %v2870_v30  ;;  %v1008_v39 = vld [vmem:[#allocation23 + $0xa8] sm:$0xff]  ;;  %v2878_v40 = vpack.c.bf16 %v990_v37, %v989_v36  ;;  %v1018_v36 = vld [vmem:[#allocation23 + $0xf8] sm:$0xff]  ;;  %v1001_v37 = vld [vmem:[#allocation23 + $0x70] sm:$0xff] }
 0x36b   :  { %v2881_v41 = vpack.c.bf16 %v1008_v39, %v1007_v38  ;;  %v1012_v15 = vld [vmem:[#allocation23 + $0xc8] sm:$0xff]  ;;  %v1806_v38 = vpack.c.bf16 %v1018_v36, %v1017_v33  ;;  %v1002_v39 = vld [vmem:[#allocation23 + $0x78] sm:$0xff] }
 0x36c   :  { %v626_v43 = vmax.f32 %v625_v42, 0.0  ;;  %1771 = vmatprep.subr.bf16.mxu1 %v1770_v17  ;;  %v991_v42 = vld [vmem:[#allocation23 + $0x20] sm:$0xff] }
 0x36d   :  { %1773 = vmatpush1.bf16.msra.mxu1 %v1772_v20  ;;  %v995_v17 = vld [vmem:[#allocation23 + $0x40] sm:$0xff]  ;;  %v1013_v20 = vld [vmem:[#allocation23 + $0xd0] sm:$0xff] }
 0x36e   :  { %v627_v44 = vadd.f32 1e-05, %v626_v43  ;;  %1775 = vmatprep.subr.bf16.mxu1 %v1774_v23  ;;  %v992_v43 = vld [vmem:[#allocation23 + $0x28] sm:$0xff]  ;;  %v2912_v19 = vpack.c.bf16 %v996_v18, %v995_v17  ;;  %v2916_v22 = vpack.c.bf16 %v1014_v21, %v1013_v20  ;;  %v997_v23 = vld [vmem:[#allocation23 + $0x50] sm:$0xff] }
 0x36f   :  { %v2884_v47 = vpack.c.bf16 %v992_v43, %v991_v42  ;;  %v1800_v25 = vpack.c.bf16 %v998_v24, %v997_v23  ;;  %v1808_v42 = vpack.c.bf16 %v1002_v39, %v1001_v37  ;;  %v875_v43 = vld [vmem:[#allocation22] sm:$0x3]  ;;  %v1369_v36 = vld [vmem:[#allocation29 + $0x10] sm:$0xff]  ;;  %v1370_v37 = vld [vmem:[#allocation29 + $0x18] sm:$0xff] }
 0x370   :  { %1906 = vrsqrt.f32 %v627_v44  ;;  %v1009_v44 = vld [vmem:[#allocation23 + $0xb0] sm:$0xff]  ;;  %v1388_v39 = vld [vmem:[#allocation29 + $0xa8] sm:$0xff] }
 0x371   :  { %1777 = vmatpush1.bf16.msra.mxu1 %v1776_v26  ;;  %v1015_v26 = vld [vmem:[#allocation23 + $0xe0] sm:$0xff] }
 0x372   :  { %v1802_v28 = vpack.c.bf16 %v1016_v27, %v1015_v26  ;;  %v1384_v26 = vld [vmem:[#allocation29 + $0x88] sm:$0xff]  ;;  %v1367_v27 = vld [vmem:[#allocation29] sm:$0xff] }
 0x373   :  { %v1844_v33 = vpack.c.bf16 %v1368_v29, %v1367_v27 }
 0x37a   :  { %v1907_v46 = vpop.eup %1906 }
 0x37b   :  { %1553 = vmatmul.mubr.msk.f32.vlgmr.msra.gmra.mrb[6].mxu0 %vm631_vm6, %v1907_v46  ;;  %v1010_v46 = vld [vmem:[#allocation23 + $0xb8] sm:$0xff] }
 0x37c   :  { %1781 = vmatpush3.bf16.msra.mxu0 %v2872_v34  ;;  %v2887_v48 = vpack.c.bf16 %v1010_v46, %v1009_v44  ;;  %v880_v44 = vrot.slane %v875_v43, %v2894_v57  ;;  %v884_v46 = vrot.slane %v875_v43, %v2898_v61 }
 0x37d   :  { %1783 = vmatprep.subr.bf16.mxu0 %v2874_v35 }
 0x380   :  { %1785 = vmatpush3.bf16.msra.mxu0 %v2878_v40 }
 0x381   :  { %1787 = vmatprep.subr.bf16.mxu0 %v2881_v41 }
 0x384   :  { %1789 = vmatpush3.bf16.msra.mxu0 %v2884_v47 }
 0x385   :  { %1791 = vmatprep.subr.bf16.mxu0 %v2887_v48 }
 0x388   :  { %1793 = vmatpush3.bf16.msra.mxu0 %v2890_v51 }
 0x43b   :  { %v708_v52 = vpop.f32.mrb[4].mxu0 }
 0x43c   :  { %v710_v54 = vpop.f32.mrb[5].mxu0  ;;  %v790_v58 = vrot.slane %v708_v52, %v2894_v57 }
 0x43d   :  { %v794_v59 = vrot.slane %v710_v54, %v2894_v57 }
 0x43e   :  { %v795_v63 = vsub.f32 %v2849_v45, %v790_v58 }
 0x43f   :  { %v796_v5 = vsub.f32 %v2855_v53, %v794_v59  ;;  %v1011_v53 = vld [vmem:[#allocation23 + $0xc0] sm:$0xff] }
 0x440   :  { %v2910_v16 = vpack.c.bf16 %v1012_v15, %v1011_v53 }
 0x442   :  { %1795 = vmatprep.subr.bf16.mxu0 %v2910_v16 }
 0x443   :  { %1797 = vmatpush3.bf16.msra.mxu0 %v2912_v19 }
 0x444   :  { %1799 = vmatprep.subr.bf16.mxu0 %v2916_v22 }
 0x447   :  { %1801 = vmatpush3.bf16.msra.mxu0 %v1800_v25 }
 0x448   :  { %1803 = vmatprep.subr.bf16.mxu0 %v1802_v28 }
 0x44b   :  { %1805 = vmatpush3.bf16.msra.mxu0 %v1804_v32 }
 0x44c   :  { %1807 = vmatprep.subr.bf16.mxu0 %v1806_v38 }
 0x44e   :  { %v782_v62 = vpop.f32.mrb[6].mxu0 }
 0x44f   :  { %v800_v0 = vrot.slane %v782_v62, %v2894_v57  ;;  %v784_v4 = vpop.f32.mrb[7].mxu0  ;;  %1809 = vmatpush3.bf16.msra.mxu0 %v1808_v42 }
 0x450   :  { %v804_v6 = vrot.slane %v784_v4, %v2894_v57  ;;  %1811 = vmatprep.subr.bf16.mxu0 %v2870_v30 }
 0x451   :  { %v805_v8 = vmul.f32 %v800_v0, %v795_v63 }
 0x452   :  { %v806_v9 = vmul.f32 %v804_v6, %v796_v5 }
 0x453   :  { %v819_v11 = vmul.f32 %v812_v2, %v805_v8 }
 0x454   :  { %v820_v45 = vmul.f32 %v816_v7, %v806_v9 }
 0x455   :  { %v833_v14 = vadd.f32 %v826_v12, %v819_v11 }
 0x456   :  { %v834_v13 = vadd.f32 %v830_v10, %v820_v45 }
 0x458   :  { %1554 = vmatprep.mubr.msk.f32.mxu1 %vm421_vm2, %v834_v13 }
 0x459   :  { %955 = vmatmul.mubr.f32.vlgmr.msra.gmra.mrb[2].mxu1 %v833_v14 }
 0x45a   :  { %1236 = vmatprep.mubr.f32.mxu1 %v2447_v1 }
 0x52c   :  { %v956_v49 = vpop.f32.mrb[2].mxu1 }
 0x52d   :  { %v2922_v50 = vadd.f32 %v956_v49, %v880_v44  ;;  %v958_v52 = vpop.f32.mrb[3].mxu1  ;;  %v1371_v44 = vld [vmem:[#allocation29 + $0x20] sm:$0xff]  ;;  %v1389_v49 = vld [vmem:[#allocation29 + $0xb0] sm:$0xff] }
 0x52e   :  { %v2924_v54 = vadd.f32 %v958_v52, %v884_v46  ;;  %v1372_v46 = vld [vmem:[#allocation29 + $0x28] sm:$0xff]  ;;  %v1390_v52 = vld [vmem:[#allocation29 + $0xb8] sm:$0xff] }
 0x52f   :  { %v961_v55 = vrot.slane %v2922_v50, 4  ;;  %v973_v12 = vmul.f32 %v2922_v50, %v2922_v50 }
 0x530   :  { %v967_v56 = vrot.slane %v2924_v54, 4  ;;  %v974_v58 = vmul.f32 %v2924_v54, %v2924_v54 }
 0x531   :  { %v962_v30 = vadd.f32 %v961_v55, %v2922_v50  ;;  %v975_v45 = vrot.slane %v973_v12, 4  ;;  %v1852_v55 = vpack.c.bf16 %v1372_v46, %v1371_v44 }
 0x532   :  { %v968_v59 = vadd.f32 %v967_v56, %v2924_v54  ;;  %v981_v60 = vrot.slane %v974_v58, 4  ;;  %v1854_v56 = vpack.c.bf16 %v1390_v52, %v1389_v49 }
 0x533   :  { %v963_v62 = vrot.slane %v962_v30, 2  ;;  %v976_v13 = vadd.f32 %v975_v45, %v973_v12  ;;  %v1379_v45 = vld [vmem:[#allocation29 + $0x60] sm:$0xff] }
 0x534   :  { %v969_v63 = vrot.slane %v968_v59, 2  ;;  %v982_v0 = vadd.f32 %v981_v60, %v974_v58  ;;  %v1373_v58 = vld [vmem:[#allocation29 + $0x30] sm:$0xff]  ;;  %v1392_v60 = vld [vmem:[#allocation29 + $0xc8] sm:$0xff] }
 0x535   :  { %v964_v2 = vadd.f32 %v963_v62, %v962_v30  ;;  %v1374_v30 = vld [vmem:[#allocation29 + $0x38] sm:$0xff] }
 0x536   :  { %v970_v3 = vadd.f32 %v969_v63, %v968_v59  ;;  %v983_v4 = vrot.slane %v982_v0, 2  ;;  %v1391_v59 = vld [vmem:[#allocation29 + $0xc0] sm:$0xff]  ;;  %v1856_v62 = vpack.c.bf16 %v1374_v30, %v1373_v58 }
 0x537   :  { %v965_v5 = vrot.slane %v964_v2, 1  ;;  %v1858_v63 = vpack.c.bf16 %v1392_v60, %v1391_v59 }
 0x538   :  { %v971_v6 = vrot.slane %v970_v3, 1  ;;  %v984_v7 = vadd.f32 %v983_v4, %v982_v0  ;;  %v1375_v0 = vld [vmem:[#allocation29 + $0x40] sm:$0xff]  ;;  %v1393_v4 = vld [vmem:[#allocation29 + $0xd0] sm:$0xff] }
 0x539   :  { %v966_v10 = vadd.f32 %v965_v5, %v964_v2  ;;  %v1376_v2 = vld [vmem:[#allocation29 + $0x48] sm:$0xff]  ;;  %v1394_v5 = vld [vmem:[#allocation29 + $0xd8] sm:$0xff] }
 0x53a   :  { %v972_v8 = vadd.f32 %v971_v6, %v970_v3  ;;  %v985_v9 = vrot.slane %v984_v7, 1  ;;  %v1860_v3 = vpack.c.bf16 %v1376_v2, %v1375_v0  ;;  %v1862_v6 = vpack.c.bf16 %v1394_v5, %v1393_v4 }
 0x53c   :  { %1083 = vmatprep.mubr.f32.mxu0 %v972_v8  ;;  %v986_v11 = vadd.f32 %v985_v9, %v984_v7  ;;  %v1377_v7 = vld [vmem:[#allocation29 + $0x50] sm:$0xff]  ;;  %v1378_v8 = vld [vmem:[#allocation29 + $0x58] sm:$0xff] }
 0x53d   :  { %1084 = vmatmul.mubr.f32.vlgmr.msra.gmra.mrb[8].mxu0 %v966_v10  ;;  %v1864_v9 = vpack.c.bf16 %v1378_v8, %v1377_v7  ;;  %v1395_v10 = vld [vmem:[#allocation29 + $0xe0] sm:$0xff] }
 0x53e   :  { %1813 = vmatpush3.bf16.msra.mxu0 %v2872_v34  ;;  %1154 = vmatprep.mubr.f32.mxu0 %v986_v11  ;;  %v977_v34 = vrot.slane %v976_v13, 2  ;;  %v1396_v11 = vld [vmem:[#allocation29 + $0xe8] sm:$0xff] }
 0x53f   :  { %1815 = vmatprep.subr.bf16.mxu0 %v2874_v35  ;;  %v1866_v12 = vpack.c.bf16 %v1396_v11, %v1395_v10  ;;  %v1558_v10 = vld [vmem:[#allocation32] ss:$0 sm:$0xff] }
 0x540   :  { %v978_v35 = vadd.f32 %v977_v34, %v976_v13  ;;  %v1380_v13 = vld [vmem:[#allocation29 + $0x68] sm:$0xff] }
 0x541   :  { %v1868_v34 = vpack.c.bf16 %v1380_v13, %v1379_v45 }
 0x542   :  { %1817 = vmatpush3.bf16.msra.mxu0 %v2878_v40  ;;  %v979_v40 = vrot.slane %v978_v35, 1 }
 0x543   :  { %1819 = vmatprep.subr.bf16.mxu0 %v2881_v41 }
 0x544   :  { %v980_v41 = vadd.f32 %v979_v40, %v978_v35  ;;  %v1397_v35 = vld [vmem:[#allocation29 + $0xf0] sm:$0xff]  ;;  %v1398_v40 = vld [vmem:[#allocation29 + $0xf8] sm:$0xff] }
 0x546   :  { %1821 = vmatpush3.bf16.msra.mxu0 %v2884_v47  ;;  %v1167_v47 = vld [vmem:[#allocation25 + $0x8] sm:$0xff] }
 0x547   :  { %1823 = vmatprep.subr.bf16.mxu0 %v2887_v48  ;;  %1172 = vmatprep.subr.mxu1 %v1167_v47  ;;  %v1166_v48 = vld [vmem:[#allocation25] sm:$0xff] }
 0x548   :  { %1173 = vmatpush1.msra.mxu1 %v1166_v48 }
 0x549   :  { %1246 = vmatprep.subr.mxu1 %v1167_v47  ;;  %v1381_v47 = vld [vmem:[#allocation29 + $0x70] sm:$0xff] }
 0x54a   :  { %1825 = vmatpush3.bf16.msra.mxu0 %v2890_v51 }
 0x54b   :  { %1827 = vmatprep.subr.bf16.mxu0 %v2910_v16 }
 0x54e   :  { %1829 = vmatpush3.bf16.msra.mxu0 %v2912_v19 }
 0x54f   :  { %1831 = vmatprep.subr.bf16.mxu0 %v2916_v22 }
 0x552   :  { %1833 = vmatpush3.bf16.msra.mxu0 %v1800_v25  ;;  %v1383_v25 = vld [vmem:[#allocation29 + $0x80] sm:$0xff] }
 0x553   :  { %1835 = vmatprep.subr.bf16.mxu0 %v1802_v28  ;;  %v1842_v28 = vpack.c.bf16 %v1384_v26, %v1383_v25 }
 0x556   :  { %1837 = vmatpush3.bf16.msra.mxu0 %v1804_v32  ;;  %v1386_v32 = vld [vmem:[#allocation29 + $0x98] sm:$0xff] }
 0x557   :  { %1839 = vmatprep.subr.bf16.mxu0 %v1806_v38  ;;  %v1387_v38 = vld [vmem:[#allocation29 + $0xa0] sm:$0xff] }
 0x558   :  { %v1850_v43 = vpack.c.bf16 %v1388_v39, %v1387_v38 }
 0x55a   :  { %1841 = vmatpush3.bf16.msra.mxu0 %v1808_v42  ;;  %v1848_v42 = vpack.c.bf16 %v1370_v37, %v1369_v36 }
 0x55d   :  { %1155 = vmatmul.mubr.f32.vlgmr.msra.gmra.mrb[10].mxu0 %v980_v41  ;;  %v1870_v41 = vpack.c.bf16 %v1398_v40, %v1397_v35 }
 0x610   :  { %v1595_v51 = vpop.f32.mrb[8].mxu0 }
 0x611   :  { %v1596_v14 = vpop.f32.mrb[9].mxu0 }
 0x612   :  { %v1597_v53 = vadd.f32 %v1596_v14, %v1595_v51 }
 0x614   :  { %v1089_v15 = vmul.f32 0.00390625, %v1597_v53 }
 0x616   :  { %1555 = vmatmul.mubr.msk.f32.vlgmr.msra.gmra.mrb[4].mxu1 %vm1168_vm7, %v1089_v15  ;;  %v1161_v19 = vmul.f32 %v1089_v15, %v1089_v15 }
 0x617   :  { %1247 = vmatpush1.msra.mxu1 %v1166_v48  ;;  %1310 = vmatprep.mubr.f32.mxu1 %v2447_v1  ;;  %v1846_v1 = vpack.c.bf16 %v1386_v32, %v1385_v31  ;;  %v1382_v48 = vld [vmem:[#allocation29 + $0x78] sm:$0xff] }
 0x618   :  { %1843 = vmatprep.subr.bf16.mxu1 %v1842_v28  ;;  %v1872_v51 = vpack.c.bf16 %v1382_v48, %v1381_v47 }
 0x630   :  { %v1630_v16 = vpop.f32.mrb[10].mxu0 }
 0x631   :  { %v1631_v17 = vpop.f32.mrb[11].mxu0 }
 0x632   :  { %v1632_v18 = vadd.f32 %v1631_v17, %v1630_v16  ;;  %v1337_v17 = vld [vmem:[#allocation26] sm:$0x3] }
 0x633   :  { %v1346_v26 = vrot.slane %v1337_v17, %v2898_v61 }
 0x634   :  { %v1160_v20 = vmul.f32 0.00390625, %v1632_v18 }
 0x636   :  { %v1162_v21 = vsub.f32 %v1160_v20, %v1161_v19  ;;  %v1351_v19 = vld [vmem:[#allocation28] sm:$0x3] }
 0x637   :  { %v1356_v28 = vrot.slane %v1351_v19, %v2894_v57  ;;  %v1360_v31 = vrot.slane %v1351_v19, %v2898_v61 }
 0x638   :  { %v1163_v22 = vmax.f32 %v1162_v21, 0.0 }
 0x63a   :  { %v1164_v23 = vadd.f32 1e-05, %v1163_v22  ;;  %v1342_v22 = vrot.slane %v1337_v17, %v2894_v57 }
 0x63c   :  { %1908 = vrsqrt.f32 %v1164_v23 }
 0x646   :  { %v1909_v24 = vpop.eup %1908 }
 0x647   :  { %1556 = vmatmul.mubr.msk.f32.vlgmr.msra.gmra.mrb[6].mxu1 %vm1168_vm7, %v1909_v24 }
 0x648   :  { %1845 = vmatpush3.bf16.msra.mxu1 %v1844_v33 }
 0x649   :  { %1847 = vmatprep.subr.bf16.mxu1 %v1846_v1 }
 0x64c   :  { %1849 = vmatpush3.bf16.msra.mxu1 %v1848_v42 }
 0x64d   :  { %1851 = vmatprep.subr.bf16.mxu1 %v1850_v43 }
 0x650   :  { %1853 = vmatpush3.bf16.msra.mxu1 %v1852_v55 }
 0x651   :  { %1855 = vmatprep.subr.bf16.mxu1 %v1854_v56 }
 0x654   :  { %1857 = vmatpush3.bf16.msra.mxu1 %v1856_v62 }
 0x655   :  { %1859 = vmatprep.subr.bf16.mxu1 %v1858_v63 }
 0x658   :  { %1861 = vmatpush3.bf16.msra.mxu1 %v1860_v3 }
 0x659   :  { %1863 = vmatprep.subr.bf16.mxu1 %v1862_v6 }
 0x65c   :  { %1865 = vmatpush3.bf16.msra.mxu1 %v1864_v9 }
 0x65d   :  { %1867 = vmatprep.subr.bf16.mxu1 %v1866_v12  ;;  %v1559_v12 = vld [vmem:[#allocation34] ss:$0 sm:$0xff] }
 0x660   :  { %1869 = vmatpush3.bf16.msra.mxu1 %v1868_v34 }
 0x661   :  { %1871 = vmatprep.subr.bf16.mxu1 %v1870_v41 }
 0x664   :  { %1873 = vmatpush3.bf16.msra.mxu1 %v1872_v51 }
 0x6e9   :  { %v1238_v14 = vpop.f32.mrb[4].mxu1 }
 0x6ea   :  { %v1240_v53 = vpop.f32.mrb[5].mxu1  ;;  %v1320_v15 = vrot.slane %v1238_v14, %v2894_v57 }
 0x6eb   :  { %v1324_v16 = vrot.slane %v1240_v53, %v2894_v57 }
 0x6ec   :  { %v1325_v20 = vsub.f32 %v2922_v50, %v1320_v15 }
 0x6ed   :  { %v1326_v24 = vsub.f32 %v2924_v54, %v1324_v16  ;;  %v1557_v54 = vld [vmem:[#allocation31] ss:$0 sm:$0xff] }
 0x71a   :  { %v1312_v18 = vpop.f32.mrb[6].mxu1 }
 0x71b   :  { %v1330_v21 = vrot.slane %v1312_v18, %v2894_v57  ;;  %v1314_v23 = vpop.f32.mrb[7].mxu1 }
 0x71c   :  { %v1334_v25 = vrot.slane %v1314_v23, %v2894_v57 }
 0x71d   :  { %v1335_v27 = vmul.f32 %v1330_v21, %v1325_v20 }
 0x71e   :  { %v1336_v29 = vmul.f32 %v1334_v25, %v1326_v24 }
 0x71f   :  { %v1349_v32 = vmul.f32 %v1342_v22, %v1335_v27 }
 0x720   :  { %v1350_v33 = vmul.f32 %v1346_v26, %v1336_v29 }
 0x721   :  { %v1363_v50 = vadd.f32 %v1356_v28, %v1349_v32 }
 0x722   :  { %v1364_v1 = vadd.f32 %v1360_v31, %v1350_v33 }
 0x723   :  { %v1365_v37 = vmax.f32 %v1363_v50, 0.0 }
 0x724   :  { %v1366_v36 = vmax.f32 %v1364_v1, 0.0 }
 0x726   :  { %1470 = vmatprep.mubr.f32.mxu1 %v1366_v36 }
 0x727   :  { %1471 = vmatmul.mubr.f32.vlgmr.msra.gmra.mrb[8].mxu1 %v1365_v37 }
 0x7fa   :  { %v1665_v38 = vpop.f32.mrb[8].mxu1 }
 0x7fb   :  { %v1666_v39 = vpop.f32.mrb[9].mxu1 }
 0x7fc   :  { %v1667_v42 = vadd.f32 %v1666_v39, %v1665_v38 }
 0x7fe   :  { %v1473_v43 = vadd.f32 %v1667_v42, %v1557_v54 }
 0x800   :  { %v1476_v44 = vsel %vm421_vm2, %v1473_v43, 0.0  ;;  %v1485_v46 = vmul.f32 %v1473_v43, %v1473_v43 }
 0x801   :  { %v1477_v57 = vrot.slane %v1476_v44, 4 }
 0x802   :  { %v1486_v49 = vsel %vm421_vm2, %v1485_v46, 0.0 }
 0x803   :  { %v1478_v61 = vadd.f32 %v1477_v57, %v1476_v44  ;;  %v1487_v52 = vrot.slane %v1486_v49, 4 }
 0x805   :  { %v1479_v55 = vrot.slane %v1478_v61, 2  ;;  %v1488_v56 = vadd.f32 %v1487_v52, %v1486_v49 }
 0x807   :  { %v1480_v58 = vadd.f32 %v1479_v55, %v1478_v61  ;;  %v1489_v30 = vrot.slane %v1488_v56, 2 }
 0x809   :  { %v1481_v59 = vrot.slane %v1480_v58, 1  ;;  %v1490_v60 = vadd.f32 %v1489_v30, %v1488_v56 }
 0x80b   :  { %v1482_v62 = vadd.f32 %v1481_v59, %v1480_v58  ;;  %v1491_v63 = vrot.slane %v1490_v60, 1 }
 0x80d   :  { %v1484_v0 = vmul.f32 0.125, %v1482_v62  ;;  %v1492_v2 = vadd.f32 %v1491_v63, %v1490_v60 }
 0x80f   :  { %v1493_v3 = vmul.f32 0.125, %v1492_v2  ;;  %v1494_v4 = vmul.f32 %v1484_v0, %v1484_v0  ;;  %v1497_v8 = vsub.f32 %v1473_v43, %v1484_v0 }
 0x811   :  { %v1495_v5 = vsub.f32 %v1493_v3, %v1494_v4 }
 0x813   :  { %v1496_v6 = vmax.f32 %v1495_v5, 0.0 }
 0x815   :  { %v1498_v7 = vadd.f32 1e-05, %v1496_v6 }
 0x817   :  { %1910 = vrsqrt.f32 %v1498_v7 }
 0x821   :  { %v1911_v9 = vpop.eup %1910 }
 0x822   :  { %v1500_v11 = vmul.f32 %v1911_v9, %v1497_v8 }
 0x824   :  { %v1508_v45 = vmul.f32 %v1558_v10, %v1500_v11 }
 0x826   :  { %v1516_v13 = vadd.f32 %v1559_v12, %v1508_v45 }
 0x828   :  { %v1517_v34 = vmax.f32 %v1516_v13, 0.0 }
 0x82a   :  { %1518 = vst.msk [vmem:[#allocation35] sm:$0xff] %vm421_vm2, %v1517_v34 }
 0x82b   :  { %2385 = shalt.err (!%p2382_p4)
}
 0x82c   :  { %s3015_s10 = sld [smem:[#allocation55_spill]] }
 0x832   :  { %s2386_s5 = scalar_lea.hbm %s3015_s10, 128 }
 0x833   :  { %p2387_p5 = scmp.ne.s32.totalorder %s3015_s10, %s2386_s5  ;;  %p2390_p6 = scmp.lt.u32.totalorder %s2386_s5, %s3015_s10 }
 0x835   :  { %p2392_p7 = pnand %p2390_p6, %p2387_p5 }
 0x837   :  { %2395 = shalt.err (!%p2392_p7)
}
 0x838   :  { %1528 = dma.vmem_to_hbm [thread:$0]  %s1526_s4, 128, %s3015_s10, [#allocation4]  }
 0x839   :  { %2418 = dma.done.wait [#allocation4], 128  }
 0x83a   :  { %2419 = vsyncadd [#allocation4], 4294967168 }
 0x83b   :  { %1532 = vsyncpa [#allocation3], 1 }
 0x83c   :  { %1533 = vsyncpa [#allocation6], 1 }
 0x83d   :  { %1534 = vsyncpa [#allocation9], 1 }
 0x83e   :  { %1535 = vsyncpa [#allocation12], 1 }
 0x83f   :  { %1536 = vsyncpa [#allocation15], 1 }
 0x840   :  { %1537 = vsyncpa [#allocation18], 1 }
 0x841   :  { %1538 = vsyncpa [#allocation21], 1 }
 0x842   :  { %1539 = vsyncpa [#allocation24], 1 }
 0x843   :  { %1540 = vsyncpa [#allocation27], 1 }
 0x844   :  { %1541 = vsyncpa [#allocation30], 1 }
 0x845   :  { %1542 = vsyncpa [#allocation33], 1 }
 0x846   :  { %1543 = vsyncpa [#allocation4], 1 }

</bundles_post_ra>
